<compile_context>
chip_gen: v7x
topology: tpu7x:2x2x1
jax: 0.10.0
libtpu: 0.0.40
codegen_flags: <defaults>
</compile_context>

<pallas_src>
import jax
import jax.numpy as jnp
from jax.experimental import pallas as pl
from jax.experimental.pallas import tpu as pltpu

SLOPE = 0.2
IN_DIM = 640
HID_DIM = 512
OUT_DIM = 512
BN_EPS = 1e-5


def passwords_mapper_kernel(x_ref, w1_ref, b1_ref, w2_ref, b2_ref, o_ref):
    # Layer 1: Linear(640 -> 512).  Cast x to bf16 inside the kernel (no
    # separate XLA cast pass); f32 accumulation on the MXU.
    x = x_ref[...].astype(jnp.bfloat16)
    h = jnp.dot(x, w1_ref[...], preferred_element_type=jnp.float32)
    h = h + b1_ref[...]
    # LeakyReLU(0.2): for 0 < slope < 1, max(h, slope*h) == leaky_relu(h).
    h = jnp.maximum(h, SLOPE * h)
    # Layer 2: Linear(512 -> 512) with eval-mode BatchNorm folded into the
    # (already scaled/shifted) weights and bias.
    out = jnp.dot(h.astype(jnp.bfloat16), w2_ref[...],
                  preferred_element_type=jnp.float32)
    o_ref[...] = (out + b2_ref[...]).astype(o_ref.dtype)


def _round_up(n, m):
    return ((n + m - 1) // m) * m


def _num_tensorcores():
    """Best-effort megacore detection; default to 1 TensorCore (safe)."""
    try:
        kind = jax.devices()[0].device_kind.lower()
        if "v7" in kind or "v4" in kind or "v3" in kind or "v5p" in kind:
            return 2
    except Exception:
        pass
    return 1


def _choose_bm(B, num_tc, cap=512):
    """Largest MXU-friendly batch tile (multiple of 16 for bf16 packing).
    Only split into >=2 grid steps when there are multiple TensorCores."""
    if num_tc > 1 and B > 16:
        per_core = pl.cdiv(B, num_tc)
        return min(_round_up(per_core, 16), cap)
    return min(_round_up(B, 16), cap)


def passwords_mapper(x, w1, b1, w2, b2, bn_scale, bn_shift, *, bm=None):
    """x: [B, 640] float.  w1: [640, 512], w2: [512, 512] (transposed vs
    PyTorch).  b1, b2, bn_scale, bn_shift: [512].  Returns [B, 512] f32."""
    B = x.shape[0]
    if bm is None:
        bm = _choose_bm(B, _num_tensorcores())

    # Fold eval-mode BatchNorm (y = h*scale + shift, applied before W2) into
    # the second linear layer.  Exact algebra, done in f32 before the bf16
    # cast to avoid compounding rounding on the weights:
    #   (h*s + t) @ W2 + b2 = h @ (s[:,None]*W2) + (t @ W2 + b2)
    s = bn_scale.astype(jnp.float32)
    t = bn_shift.astype(jnp.float32)
    w2_f32 = w2.astype(jnp.float32)
    w2_fold = (s[:, None] * w2_f32).astype(jnp.bfloat16)
    b2_fold = (t @ w2_f32 + b2.astype(jnp.float32)).reshape(1, OUT_DIM)

    w1b = w1.astype(jnp.bfloat16)
    b1r = b1.reshape(1, HID_DIM).astype(jnp.float32)

    grid = (pl.cdiv(B, bm),)
    flops = 2 * B * (IN_DIM * HID_DIM + HID_DIM * OUT_DIM)
    bytes_accessed = (B * IN_DIM * x.dtype.itemsize   # x
                      + IN_DIM * HID_DIM * 2          # W1 (bf16)
                      + HID_DIM * OUT_DIM * 2         # W2 (bf16, BN folded)
                      + 2 * HID_DIM * 4               # b1, b2' (f32)
                      + B * OUT_DIM * 4)              # output (f32)

    return pl.pallas_call(
        passwords_mapper_kernel,
        out_shape=jax.ShapeDtypeStruct((B, OUT_DIM), jnp.float32),
        grid_spec=pl.GridSpec(
            grid=grid,
            in_specs=[
                pl.BlockSpec((bm, IN_DIM), lambda i: (i, 0)),        # x tile
                pl.BlockSpec((IN_DIM, HID_DIM), lambda i: (0, 0)),   # W1 (resident)
                pl.BlockSpec((1, HID_DIM), lambda i: (0, 0)),        # b1
                pl.BlockSpec((HID_DIM, OUT_DIM), lambda i: (0, 0)),  # W2' (resident)
                pl.BlockSpec((1, OUT_DIM), lambda i: (0, 0)),        # b2'
            ],
            out_specs=pl.BlockSpec((bm, OUT_DIM), lambda i: (i, 0)),
        ),
        compiler_params=pltpu.CompilerParams(
            dimension_semantics=("parallel",),
            vmem_limit_bytes=32 * 1024 * 1024,
        ),
        cost_estimate=pl.CostEstimate(
            flops=flops, transcendentals=0, bytes_accessed=bytes_accessed),
    )(x, w1b, b1r, w2_fold, b2_fold)


def fold_batchnorm(gamma, beta, running_mean, running_var, eps=BN_EPS):
    """Eval-mode BatchNorm1d as per-channel scale/shift: y = x*scale + shift."""
    scale = gamma / jnp.sqrt(running_var + eps)
    shift = beta - running_mean * scale
    return scale, shift


def init_params(key):
    """kaiming_normal_(a=0.2) (fan_in, leaky_relu gain) on weights of PyTorch
    shape [out, in]; biases = 0.  Weights returned transposed ([in, out])."""
    gain = (2.0 / (1.0 + SLOPE ** 2)) ** 0.5
    k1, k2 = jax.random.split(key)
    std1 = gain / (IN_DIM ** 0.5)    # fan_in = 640
    std2 = gain / (HID_DIM ** 0.5)   # fan_in = 512
    w1_pt = jax.random.normal(k1, (HID_DIM, IN_DIM), dtype=jnp.float32) * std1
    w2_pt = jax.random.normal(k2, (OUT_DIM, HID_DIM), dtype=jnp.float32) * std2
    w1 = w1_pt.T                      # [640, 512]
    w2 = w2_pt.T                      # [512, 512]
    b1 = jnp.zeros((HID_DIM,), dtype=jnp.float32)
    b2 = jnp.zeros((OUT_DIM,), dtype=jnp.float32)
    return w1, b1, w2, b2


def init_bn(key):
    """Non-trivial BN parameters / running stats to exercise the folded path.
    (PyTorch defaults would be gamma=1, beta=0, mean=0, var=1.)"""
    kg, kb, km, kv = jax.random.split(key, 4)
    gamma = 1.0 + 0.1 * jax.random.normal(kg, (HID_DIM,), dtype=jnp.float32)
    beta = 0.1 * jax.random.normal(kb, (HID_DIM,), dtype=jnp.float32)
    running_mean = 0.1 * jax.random.normal(km, (HID_DIM,), dtype=jnp.float32)
    running_var = 0.5 + jnp.abs(jax.random.normal(kv, (HID_DIM,), dtype=jnp.float32)) * 0.5
    return gamma, beta, running_mean, running_var


def reference_f32(x, w1, b1, w2, b2, gamma, beta, running_mean, running_var,
                  eps=BN_EPS):
    """Pure-JAX f32 reference with the exact PyTorch module semantics
    (Linear -> LeakyReLU(0.2) -> BatchNorm1d(eval) -> Linear)."""
    h = x @ w1 + b1
    h = jnp.where(h >= 0, h, SLOPE * h)
    h = (h - running_mean) / jnp.sqrt(running_var + eps) * gamma + beta
    return h @ w2 + b2


if __name__ == "__main__":
    key = jax.random.PRNGKey(0)
    kx, kp, kb = jax.random.split(key, 3)

    # Small batch; 24 is not a multiple of 16 so the partial-last-block
    # (masked-store) path is exercised too.
    B = 24
    x = jax.random.normal(kx, (B, IN_DIM), dtype=jnp.float32)
    w1, b1, w2, b2 = init_params(kp)
    gamma, beta, running_mean, running_var = init_bn(kb)
    bn_scale, bn_shift = fold_batchnorm(gamma, beta, running_mean, running_var)

    out = passwords_mapper(x, w1, b1, w2, b2, bn_scale, bn_shift)
    out = jax.block_until_ready(out)

    ref = reference_f32(x, w1, b1, w2, b2, gamma, beta, running_mean, running_var)
    assert out.shape == (B, OUT_DIM)
    assert out.dtype == jnp.float32
    # bf16 MXU operands with f32 accumulation vs a pure-f32 reference.
    assert jnp.allclose(out, ref, atol=5e-2, rtol=5e-2), "mismatch vs f32 reference"

    print("KERNEL_OK")
</pallas_src>

<mosaic_0001>
module attributes {stable_mosaic.version = 11 : i64} {
  func.func @passwords_mapper_kernel(%arg0: i32, %arg1: memref<32x640xf32, #tpu.memory_space<vmem>>, %arg2: memref<640x512xbf16, #tpu.memory_space<vmem>>, %arg3: memref<1x512xf32, #tpu.memory_space<vmem>>, %arg4: memref<512x512xbf16, #tpu.memory_space<vmem>>, %arg5: memref<1x512xf32, #tpu.memory_space<vmem>>, %arg6: memref<32x512xf32, #tpu.memory_space<vmem>>) attributes {dimension_semantics = [#tpu.dimension_semantics<parallel>], iteration_bounds = array<i64: 1>, scalar_prefetch = 0 : i64, scratch_operands = 0 : i64, tpu.core_type = #tpu.core_type<tc>, window_params = [{transform_indices = @transform_0, window_bounds = array<i64: 32, 640>}, {pipeline_mode = #tpu.pipeline_mode<synchronous>, transform_indices = @transform_1, window_bounds = array<i64: 640, 512>}, {pipeline_mode = #tpu.pipeline_mode<synchronous>, transform_indices = @transform_2, window_bounds = array<i64: 1, 512>}, {pipeline_mode = #tpu.pipeline_mode<synchronous>, transform_indices = @transform_3, window_bounds = array<i64: 512, 512>}, {pipeline_mode = #tpu.pipeline_mode<synchronous>, transform_indices = @transform_4, window_bounds = array<i64: 1, 512>}, {transform_indices = @transform_5, window_bounds = array<i64: 32, 512>}]} {
    %c0 = arith.constant 0 : index
    %c0_0 = arith.constant 0 : index
    %0 = vector.load %arg1[%c0, %c0_0] : memref<32x640xf32, #tpu.memory_space<vmem>>, vector<32x640xf32>
    %1 = arith.truncf %0 : vector<32x640xf32> to vector<32x640xbf16>
    %c0_1 = arith.constant 0 : index
    %c0_2 = arith.constant 0 : index
    %2 = vector.load %arg2[%c0_1, %c0_2] : memref<640x512xbf16, #tpu.memory_space<vmem>>, vector<640x512xbf16>
    %cst = arith.constant dense<0.000000e+00> : vector<32x512xf32>
    %3 = tpu.matmul %1, %2, %cst {dimension_numbers = #tpu.dot_dimension_numbers<[1], [0], [0], [1], [0, 0, 1, 1], [], []>} : vector<32x640xbf16>, vector<640x512xbf16>, vector<32x512xf32> -> vector<32x512xf32>
    %c0_3 = arith.constant 0 : index
    %c0_4 = arith.constant 0 : index
    %4 = vector.load %arg3[%c0_3, %c0_4] : memref<1x512xf32, #tpu.memory_space<vmem>>, vector<1x512xf32>
    %5 = vector.broadcast %4 : vector<1x512xf32> to vector<32x512xf32>
    %6 = arith.addf %3, %5 : vector<32x512xf32>
    %cst_5 = arith.constant 2.000000e-01 : f32
    %7 = vector.broadcast %cst_5 : f32 to vector<32x512xf32>
    %8 = arith.mulf %7, %6 : vector<32x512xf32>
    %9 = arith.maximumf %6, %8 : vector<32x512xf32>
    %10 = arith.truncf %9 : vector<32x512xf32> to vector<32x512xbf16>
    %c0_6 = arith.constant 0 : index
    %c0_7 = arith.constant 0 : index
    %11 = vector.load %arg4[%c0_6, %c0_7] : memref<512x512xbf16, #tpu.memory_space<vmem>>, vector<512x512xbf16>
    %cst_8 = arith.constant dense<0.000000e+00> : vector<32x512xf32>
    %12 = tpu.matmul %10, %11, %cst_8 {dimension_numbers = #tpu.dot_dimension_numbers<[1], [0], [0], [1], [0, 0, 1, 1], [], []>} : vector<32x512xbf16>, vector<512x512xbf16>, vector<32x512xf32> -> vector<32x512xf32>
    %c0_9 = arith.constant 0 : index
    %c0_10 = arith.constant 0 : index
    %13 = vector.load %arg5[%c0_9, %c0_10] : memref<1x512xf32, #tpu.memory_space<vmem>>, vector<1x512xf32>
    %14 = vector.broadcast %13 : vector<1x512xf32> to vector<32x512xf32>
    %15 = arith.addf %12, %14 : vector<32x512xf32>
    %c0_11 = arith.constant 0 : index
    %c0_12 = arith.constant 0 : index
    %16 = vector.load %arg6[%c0_11, %c0_12] : memref<32x512xf32, #tpu.memory_space<vmem>>, vector<32x512xf32>
    tpu.vector_store %arg6[%c0_11, %c0_12], %15 {strides = array<i32>} : memref<32x512xf32, #tpu.memory_space<vmem>>, vector<32x512xf32>,
    return
  }
  func.func @transform_0(%arg0: i32) -> (i32, i32) {
    %c0_i32 = arith.constant 0 : i32
    %c0_i32_0 = arith.constant 0 : i32
    return %arg0, %c0_i32 : i32, i32
  }
  func.func @transform_1(%arg0: i32) -> (i32, i32) {
    %c0_i32 = arith.constant 0 : i32
    %c0_i32_0 = arith.constant 0 : i32
    %c0_i32_1 = arith.constant 0 : i32
    return %c0_i32, %c0_i32_0 : i32, i32
  }
  func.func @transform_2(%arg0: i32) -> (i32, i32) {
    %c0_i32 = arith.constant 0 : i32
    %c0_i32_0 = arith.constant 0 : i32
    %c0_i32_1 = arith.constant 0 : i32
    return %c0_i32, %c0_i32_0 : i32, i32
  }
  func.func @transform_3(%arg0: i32) -> (i32, i32) {
    %c0_i32 = arith.constant 0 : i32
    %c0_i32_0 = arith.constant 0 : i32
    %c0_i32_1 = arith.constant 0 : i32
    return %c0_i32, %c0_i32_0 : i32, i32
  }
  func.func @transform_4(%arg0: i32) -> (i32, i32) {
    %c0_i32 = arith.constant 0 : i32
    %c0_i32_0 = arith.constant 0 : i32
    %c0_i32_1 = arith.constant 0 : i32
    return %c0_i32, %c0_i32_0 : i32, i32
  }
  func.func @transform_5(%arg0: i32) -> (i32, i32) {
    %c0_i32 = arith.constant 0 : i32
    %c0_i32_0 = arith.constant 0 : i32
    return %arg0, %c0_i32 : i32, i32
  }
}

</mosaic_0001>

<bundles_post_ra>
// kernel: tpu_custom_call.1
= control target key start
LH: loop header
LB: loop body
LE: loop exit
PB: predicated region body
PF: predicated region fallthrough
CT: control target
= control target key end

     0   :  { %10 = vsyncpa [#allocation3], 0  ;;  %s3509_s0 = inlined_call_operand.hbm [shape: f32[24,640], index: 0, kind: input, shape index: {}]   ;;  %s3510_s1 = inlined_call_operand.hbm [shape: bf16[640,512], index: 1, kind: input, shape index: {}]   ;;  %s3511_s2 = inlined_call_operand.vmem [shape: f32[1,512], index: 2, kind: input, shape index: {}]   ;;  %s3512_s3 = inlined_call_operand.hbm [shape: bf16[512,512], index: 3, kind: input, shape index: {}]   ;;  %s3513_s4 = inlined_call_operand.vmem [shape: f32[1,512], index: 4, kind: input, shape index: {}]   ;;  %s3514_s5 = inlined_call_operand.hbm [shape: f32[24,512], index: 5, kind: output, shape index: {}]  }
   0x1   :  { %11 = vsyncpa [#allocation6], 0 }
   0x2   :  { %12 = vsyncpa [#allocation4], 0 }
   0x3   :  { %17 = vsyncadd [#allocation3], 640  ;;  %s3374_s18 = smov [#allocation5]   ;;  %s3280_s22 = scalar_lea.hbm %s3510_s1, 20480 }
   0x4   :  { %s30_s19 = sshll.u32 %s3374_s18, 4  ;;  %p3281_p0 = scmp.ne.s32.totalorder %s3510_s1, %s3280_s22  ;;  %s31_s19 = int_to_ptr.vmem [resolvable:$true] %s30_s19 }
   0x5   :  { %p3284_p1 = scmp.lt.u32.totalorder %s3280_s22, %s3510_s1 }
   0x7   :  { %p3286_p2 = pnand %p3284_p1, %p3281_p0 }
   0x9   :  { %3289 = shalt.err (!%p3286_p2)
}
   0xa   :  { %s3290_s27 = scalar_lea.vmem %s31_s19, 20480  ;;  %p3295_p4 = scmp.lt.s32.totalorder %s31_s19, %s31_s19 }
   0xb   :  { %p3291_p3 = scmp.ne.s32.totalorder %s31_s19, %s3290_s27  ;;  %p3296_p5 = scmp.lt.s32.totalorder %s3290_s27, %s3290_s27 }
   0xd   :  { %p3297_p6 = por %p3296_p5, %p3295_p4 }
   0xf   :  { %p3298_p7 = pnand %p3297_p6, %p3291_p3 }
  0x11   :  { %3301 = shalt.err (!%p3298_p7)
}
  0x12   :  { %s3375_s28 = smov 256   ;;  %s3376_s29 = smov 16  }
  0x13   :  { %36 = dma.hbm_to_vmem [thread:$0]  %s3510_s1, 20480, %s31_s19, [#allocation6], %s3375_s28, %s3375_s28, %s3376_s29  }
  0x14   :  { %s3377_s7 = smov [#allocation2]   ;;  %s3302_s11 = scalar_lea.hbm %s3509_s0, 1920 }
  0x15   :  { %s18_s8 = sshll.u32 %s3377_s7, 4  ;;  %p3303_p8 = scmp.ne.s32.totalorder %s3509_s0, %s3302_s11  ;;  %s19_s8 = int_to_ptr.vmem [resolvable:$true] %s18_s8 }
  0x16   :  { %p3306_p9 = scmp.lt.u32.totalorder %s3302_s11, %s3509_s0 }
  0x18   :  { %p3308_p10 = pnand %p3306_p9, %p3303_p8 }
  0x1a   :  { %3311 = shalt.err (!%p3308_p10)
}
  0x1b   :  { %s3312_s16 = scalar_lea.vmem %s19_s8, 1920  ;;  %s3316_s1 = scalar_lea.vmem %s19_s8, 2560 }
  0x1c   :  { %p3313_p11 = scmp.ne.s32.totalorder %s19_s8, %s3312_s16  ;;  %p3317_p12 = scmp.lt.s32.totalorder %s19_s8, %s19_s8 }
  0x1d   :  { %p3318_p13 = scmp.lt.s32.totalorder %s3316_s1, %s3312_s16 }
  0x1f   :  { %p3319_p0 = por %p3318_p13, %p3317_p12 }
  0x21   :  { %p3320_p1 = pnand %p3319_p0, %p3313_p11 }
  0x23   :  { %3323 = shalt.err (!%p3320_p1)
}
  0x24   :  { %s3378_s17 = smov 640   ;;  %s3379_s18 = smov 40  }
  0x25   :  { %24 = dma.hbm_to_vmem [thread:$0]  %s3509_s0, 1920, %s19_s8, [#allocation3], %s3378_s17, %s3378_s17, %s3379_s18  }
  0x26   :  { %s3380_s21 = smov [#allocation7]   ;;  %s3324_s25 = scalar_lea.hbm %s3512_s3, 16384 }
  0x27   :  { %s44_s22 = sshll.u32 %s3380_s21, 4  ;;  %p3325_p2 = scmp.ne.s32.totalorder %s3512_s3, %s3324_s25  ;;  %s45_s22 = int_to_ptr.vmem [resolvable:$true] %s44_s22 }
  0x28   :  { %p3328_p3 = scmp.lt.u32.totalorder %s3324_s25, %s3512_s3 }
  0x2a   :  { %p3330_p4 = pnand %p3328_p3, %p3325_p2 }
  0x2c   :  { %3333 = shalt.err (!%p3330_p4)
}
  0x2d   :  { %s3334_s7 = scalar_lea.vmem %s45_s22, 16384  ;;  %p3339_p6 = scmp.lt.s32.totalorder %s45_s22, %s45_s22 }
  0x2e   :  { %p3335_p5 = scmp.ne.s32.totalorder %s45_s22, %s3334_s7  ;;  %p3340_p7 = scmp.lt.s32.totalorder %s3334_s7, %s3334_s7 }
  0x30   :  { %p3341_p8 = por %p3340_p7, %p3339_p6 }
  0x32   :  { %p3342_p9 = pnand %p3341_p8, %p3335_p5 }
  0x34   :  { %3345 = shalt.err (!%p3342_p9)
}
  0x35   :  { %50 = dma.hbm_to_vmem [thread:$0]  %s3512_s3, 16384, %s45_s22, [#allocation6], %s3375_s28, %s3375_s28, %s3376_s29  }
  0x36   :  { %3368 = dma.done.wait [#allocation3], 2560  }
  0x37   :  { %3369 = vsyncadd [#allocation3], 4294964736 }
  0x38   :  { %3370 = dma.done.wait [#allocation6], 36864  }
  0x39   :  { %3371 = vsyncadd [#allocation6], 4294930432  ;;  %v2848_v0 = vld [vmem:[#allocation5 + $0x4] ss:$16 sps:$4 sm:$0xff]   ;;  %v2850_v1 = vld [vmem:[#allocation5 + $0xc] ss:$16 sps:$4 sm:$0xff]  }
  0x3a   :  { %1075 = vmatprep.subr.bf16.mxu0 %v2848_v0  ;;  %v2852_v2 = vld [vmem:[#allocation5] ss:$16 sps:$4 sm:$0xff]   ;;  %v2853_v3 = vld [vmem:[#allocation5 + $0x8] ss:$16 sps:$4 sm:$0xff]   ;;  %1234 = vmatprep.subr.bf16.mxu1 %v2850_v1  ;;  %v2854_v4 = vld [vmem:[#allocation5 + $0x24] ss:$16 sps:$4 sm:$0xff]  }
  0x3b   :  { %1076 = vmatpush1.bf16.msra.mxu0 %v2852_v2  ;;  %1235 = vmatpush1.bf16.msra.mxu1 %v2853_v3  ;;  %v2856_v5 = vld [vmem:[#allocation5 + $0x2c] ss:$16 sps:$4 sm:$0xff]   ;;  %v2858_v6 = vld [vmem:[#allocation5 + $0x20] ss:$16 sps:$4 sm:$0xff]   ;;  %v2859_v7 = vld [vmem:[#allocation5 + $0x28] ss:$16 sps:$4 sm:$0xff]  }
  0x3c   :  { %1077 = vmatprep.subr.bf16.mxu0 %v2854_v4  ;;  %1236 = vmatprep.subr.bf16.mxu1 %v2856_v5  ;;  %v2860_v8 = vld [vmem:[#allocation5 + $0x44] ss:$16 sps:$4 sm:$0xff]   ;;  %v2862_v9 = vld [vmem:[#allocation5 + $0x4c] ss:$16 sps:$4 sm:$0xff]   ;;  %v2864_v10 = vld [vmem:[#allocation5 + $0x40] ss:$16 sps:$4 sm:$0xff]  }
  0x3d   :  { %v2865_v11 = vld [vmem:[#allocation5 + $0x48] ss:$16 sps:$4 sm:$0xff]   ;;  %v2866_v12 = vld [vmem:[#allocation5 + $0x64] ss:$16 sps:$4 sm:$0xff]   ;;  %v2868_v13 = vld [vmem:[#allocation5 + $0x6c] ss:$16 sps:$4 sm:$0xff]  }
  0x3e   :  { %v2870_v14 = vld [vmem:[#allocation5 + $0x60] ss:$16 sps:$4 sm:$0xff]   ;;  %v2871_v15 = vld [vmem:[#allocation5 + $0x68] ss:$16 sps:$4 sm:$0xff]   ;;  %v2872_v16 = vld [vmem:[#allocation5 + $0x84] ss:$16 sps:$4 sm:$0xff]  }
  0x3f   :  { %1078 = vmatpush1.bf16.msra.mxu0 %v2858_v6  ;;  %1237 = vmatpush1.bf16.msra.mxu1 %v2859_v7  ;;  %v2874_v17 = vld [vmem:[#allocation5 + $0x8c] ss:$16 sps:$4 sm:$0xff]   ;;  %v2876_v18 = vld [vmem:[#allocation5 + $0x80] ss:$16 sps:$4 sm:$0xff]   ;;  %v2877_v19 = vld [vmem:[#allocation5 + $0x88] ss:$16 sps:$4 sm:$0xff]  }
  0x40   :  { %1079 = vmatprep.subr.bf16.mxu0 %v2860_v8  ;;  %1238 = vmatprep.subr.bf16.mxu1 %v2862_v9  ;;  %v2878_v20 = vld [vmem:[#allocation5 + $0xa4] ss:$16 sps:$4 sm:$0xff]   ;;  %v2880_v21 = vld [vmem:[#allocation5 + $0xac] ss:$16 sps:$4 sm:$0xff]   ;;  %v2882_v22 = vld [vmem:[#allocation5 + $0xa0] ss:$16 sps:$4 sm:$0xff]  }
  0x41   :  { %v2883_v23 = vld [vmem:[#allocation5 + $0xa8] ss:$16 sps:$4 sm:$0xff]   ;;  %v2884_v24 = vld [vmem:[#allocation5 + $0xc4] ss:$16 sps:$4 sm:$0xff]   ;;  %v2886_v25 = vld [vmem:[#allocation5 + $0xcc] ss:$16 sps:$4 sm:$0xff]  }
  0x42   :  { %v2888_v26 = vld [vmem:[#allocation5 + $0xc0] ss:$16 sps:$4 sm:$0xff]   ;;  %v2889_v27 = vld [vmem:[#allocation5 + $0xc8] ss:$16 sps:$4 sm:$0xff]   ;;  %v2890_v28 = vld [vmem:[#allocation5 + $0xe4] ss:$16 sps:$4 sm:$0xff]  }
  0x43   :  { %1080 = vmatpush1.bf16.msra.mxu0 %v2864_v10  ;;  %1239 = vmatpush1.bf16.msra.mxu1 %v2865_v11  ;;  %v2892_v29 = vld [vmem:[#allocation5 + $0xec] ss:$16 sps:$4 sm:$0xff]   ;;  %v2894_v30 = vld [vmem:[#allocation5 + $0xe0] ss:$16 sps:$4 sm:$0xff]   ;;  %v2895_v31 = vld [vmem:[#allocation5 + $0xe8] ss:$16 sps:$4 sm:$0xff]  }
  0x44   :  { %1081 = vmatprep.subr.bf16.mxu0 %v2866_v12  ;;  %1240 = vmatprep.subr.bf16.mxu1 %v2868_v13  ;;  %v2896_v32 = vld [vmem:[#allocation5 + $0x104] ss:$16 sps:$4 sm:$0xff]   ;;  %v2898_v33 = vld [vmem:[#allocation5 + $0x10c] ss:$16 sps:$4 sm:$0xff]   ;;  %v2900_v34 = vld [vmem:[#allocation5 + $0x100] ss:$16 sps:$4 sm:$0xff]  }
  0x45   :  { %v2901_v35 = vld [vmem:[#allocation5 + $0x108] ss:$16 sps:$4 sm:$0xff]   ;;  %v2902_v36 = vld [vmem:[#allocation5 + $0x124] ss:$16 sps:$4 sm:$0xff]   ;;  %v2904_v37 = vld [vmem:[#allocation5 + $0x12c] ss:$16 sps:$4 sm:$0xff]  }
  0x46   :  { %v2906_v38 = vld [vmem:[#allocation5 + $0x120] ss:$16 sps:$4 sm:$0xff]   ;;  %v2907_v39 = vld [vmem:[#allocation5 + $0x128] ss:$16 sps:$4 sm:$0xff]   ;;  %v2908_v40 = vld [vmem:[#allocation5 + $0x144] ss:$16 sps:$4 sm:$0xff]  }
  0x47   :  { %1082 = vmatpush1.bf16.msra.mxu0 %v2870_v14  ;;  %1241 = vmatpush1.bf16.msra.mxu1 %v2871_v15  ;;  %v2910_v41 = vld [vmem:[#allocation5 + $0x14c] ss:$16 sps:$4 sm:$0xff]   ;;  %v2912_v42 = vld [vmem:[#allocation5 + $0x140] ss:$16 sps:$4 sm:$0xff]   ;;  %v2913_v43 = vld [vmem:[#allocation5 + $0x148] ss:$16 sps:$4 sm:$0xff]  }
  0x48   :  { %1083 = vmatprep.subr.bf16.mxu0 %v2872_v16  ;;  %1242 = vmatprep.subr.bf16.mxu1 %v2874_v17  ;;  %v2914_v44 = vld [vmem:[#allocation5 + $0x164] ss:$16 sps:$4 sm:$0xff]   ;;  %v2916_v45 = vld [vmem:[#allocation5 + $0x16c] ss:$16 sps:$4 sm:$0xff]   ;;  %v2918_v48 = vld [vmem:[#allocation5 + $0x160] ss:$16 sps:$4 sm:$0xff]  }
  0x49   :  { %v64_v46 = vld [vmem:[#allocation2 + $0x8] sm:$0xff]  ;;  %v69_v47 = vld [vmem:[#allocation2 + $0x30] sm:$0xff]  ;;  %v63_v4 = vld [vmem:[#allocation2] sm:$0xff] }
  0x4a   :  { %v2919_v49 = vld [vmem:[#allocation5 + $0x168] ss:$16 sps:$4 sm:$0xff]   ;;  %v84_v50 = vpack.c.bf16 %v69_v47, %v64_v46  ;;  %v2920_v51 = vld [vmem:[#allocation5 + $0x184] ss:$16 sps:$4 sm:$0xff]   ;;  %v2922_v52 = vld [vmem:[#allocation5 + $0x18c] ss:$16 sps:$4 sm:$0xff]  }
  0x4b   :  { %1084 = vmatpush1.bf16.msra.mxu0 %v2876_v18  ;;  %1243 = vmatpush1.bf16.msra.mxu1 %v2877_v19  ;;  %v2924_v53 = vld [vmem:[#allocation5 + $0x180] ss:$16 sps:$4 sm:$0xff]   ;;  %v2925_v54 = vld [vmem:[#allocation5 + $0x188] ss:$16 sps:$4 sm:$0xff]   ;;  %v2926_v55 = vld [vmem:[#allocation5 + $0x1a4] ss:$16 sps:$4 sm:$0xff]  }
  0x4c   :  { %1085 = vmatprep.subr.bf16.mxu0 %v2878_v20  ;;  %1244 = vmatprep.subr.bf16.mxu1 %v2880_v21  ;;  %v2928_v56 = vld [vmem:[#allocation5 + $0x1ac] ss:$16 sps:$4 sm:$0xff]   ;;  %v2930_v57 = vld [vmem:[#allocation5 + $0x1a0] ss:$16 sps:$4 sm:$0xff]   ;;  %v2931_v58 = vld [vmem:[#allocation5 + $0x1a8] ss:$16 sps:$4 sm:$0xff]  }
  0x4d   :  { %1107 = vmatprep.mubr.bf16.mxu0 %v84_v50  ;;  %1266 = vmatprep.mubr.bf16.mxu1 %v84_v50  ;;  %v2932_v59 = vld [vmem:[#allocation5 + $0x1c4] ss:$16 sps:$4 sm:$0xff]   ;;  %v2934_v60 = vld [vmem:[#allocation5 + $0x1cc] ss:$16 sps:$4 sm:$0xff]   ;;  %v2936_v61 = vld [vmem:[#allocation5 + $0x1c0] ss:$16 sps:$4 sm:$0xff]  }
  0x4e   :  { %v2937_v62 = vld [vmem:[#allocation5 + $0x1c8] ss:$16 sps:$4 sm:$0xff]   ;;  %v2938_v63 = vld [vmem:[#allocation5 + $0x1e4] ss:$16 sps:$4 sm:$0xff]   ;;  %v2940_v0 = vld [vmem:[#allocation5 + $0x1ec] ss:$16 sps:$4 sm:$0xff]  }
  0x4f   :  { %1086 = vmatpush1.bf16.msra.mxu0 %v2882_v22  ;;  %1245 = vmatpush1.bf16.msra.mxu1 %v2883_v23  ;;  %v2942_v1 = vld [vmem:[#allocation5 + $0x1e0] ss:$16 sps:$4 sm:$0xff]   ;;  %v2943_v2 = vld [vmem:[#allocation5 + $0x1e8] ss:$16 sps:$4 sm:$0xff]   ;;  %v2946_v3 = vld [vmem:[#allocation5 + $0x204] ss:$16 sps:$4 sm:$0xff]  }
  0x50   :  { %1087 = vmatprep.subr.bf16.mxu0 %v2884_v24  ;;  %1246 = vmatprep.subr.bf16.mxu1 %v2886_v25  ;;  %v68_v5 = vld [vmem:[#allocation2 + $0x28] sm:$0xff]  ;;  %v2944_v7 = vld [vmem:[#allocation5 + $0x200] ss:$16 sps:$4 sm:$0xff]   ;;  %v2952_v10 = vld [vmem:[#allocation5 + $0x224] ss:$16 sps:$4 sm:$0xff]  }
  0x51   :  { %v2949_v6 = vld [vmem:[#allocation5 + $0x20c] ss:$16 sps:$4 sm:$0xff]   ;;  %v2947_v8 = vld [vmem:[#allocation5 + $0x208] ss:$16 sps:$4 sm:$0xff]   ;;  %v83_v9 = vpack.c.bf16 %v68_v5, %v63_v4  ;;  %v2950_v12 = vld [vmem:[#allocation5 + $0x220] ss:$16 sps:$4 sm:$0xff]  }
  0x52   :  { %v2955_v11 = vld [vmem:[#allocation5 + $0x22c] ss:$16 sps:$4 sm:$0xff]   ;;  %v2953_v13 = vld [vmem:[#allocation5 + $0x228] ss:$16 sps:$4 sm:$0xff]   ;;  %v2958_v14 = vld [vmem:[#allocation5 + $0x244] ss:$16 sps:$4 sm:$0xff]  }
  0x53   :  { %1088 = vmatpush1.bf16.msra.mxu0 %v2888_v26  ;;  %1247 = vmatpush1.bf16.msra.mxu1 %v2889_v27  ;;  %v2961_v15 = vld [vmem:[#allocation5 + $0x24c] ss:$16 sps:$4 sm:$0xff]   ;;  %v2956_v16 = vld [vmem:[#allocation5 + $0x240] ss:$16 sps:$4 sm:$0xff]   ;;  %v2959_v17 = vld [vmem:[#allocation5 + $0x248] ss:$16 sps:$4 sm:$0xff]  }
  0x54   :  { %1089 = vmatprep.subr.bf16.mxu0 %v2890_v28  ;;  %1248 = vmatprep.subr.bf16.mxu1 %v2892_v29  ;;  %v2964_v18 = vld [vmem:[#allocation5 + $0x264] ss:$16 sps:$4 sm:$0xff]   ;;  %v2967_v19 = vld [vmem:[#allocation5 + $0x26c] ss:$16 sps:$4 sm:$0xff]   ;;  %v2962_v20 = vld [vmem:[#allocation5 + $0x260] ss:$16 sps:$4 sm:$0xff]  }
  0x55   :  { %v2965_v21 = vld [vmem:[#allocation5 + $0x268] ss:$16 sps:$4 sm:$0xff]   ;;  %v2970_v22 = vld [vmem:[#allocation5 + $0x284] ss:$16 sps:$4 sm:$0xff]   ;;  %v2973_v23 = vld [vmem:[#allocation5 + $0x28c] ss:$16 sps:$4 sm:$0xff]  }
  0x56   :  { %v2968_v24 = vld [vmem:[#allocation5 + $0x280] ss:$16 sps:$4 sm:$0xff]   ;;  %v2971_v25 = vld [vmem:[#allocation5 + $0x288] ss:$16 sps:$4 sm:$0xff]   ;;  %v2976_v26 = vld [vmem:[#allocation5 + $0x2a4] ss:$16 sps:$4 sm:$0xff]  }
  0x57   :  { %1090 = vmatpush1.bf16.msra.mxu0 %v2894_v30  ;;  %1249 = vmatpush1.bf16.msra.mxu1 %v2895_v31  ;;  %v2979_v27 = vld [vmem:[#allocation5 + $0x2ac] ss:$16 sps:$4 sm:$0xff]   ;;  %v79_v29 = vld [vmem:[#allocation2 + $0x80] sm:$0xff]  ;;  %v2989_v46 = vld [vmem:[#allocation5 + $0x2e8] ss:$16 sps:$4 sm:$0xff]  }
  0x58   :  { %1091 = vmatprep.subr.bf16.mxu0 %v2896_v32  ;;  %1250 = vmatprep.subr.bf16.mxu1 %v2898_v33  ;;  %v74_v28 = vld [vmem:[#allocation2 + $0x58] sm:$0xff]  ;;  %v2974_v30 = vld [vmem:[#allocation5 + $0x2a0] ss:$16 sps:$4 sm:$0xff]   ;;  %v2982_v33 = vld [vmem:[#allocation5 + $0x2c4] ss:$16 sps:$4 sm:$0xff]  }
  0x59   :  { %v89_v31 = vpack.c.bf16 %v79_v29, %v74_v28  ;;  %v2977_v32 = vld [vmem:[#allocation5 + $0x2a8] ss:$16 sps:$4 sm:$0xff]   ;;  %v2994_v47 = vld [vmem:[#allocation5 + $0x304] ss:$16 sps:$4 sm:$0xff]   ;;  %v3027_v4 = vld [vmem:[#allocation5 + $0x3ac] ss:$16 sps:$4 sm:$0xff]  }
  0x5a   :  { %v2995_v50 = vld [vmem:[#allocation5 + $0x308] ss:$16 sps:$4 sm:$0xff]   ;;  %v3022_v5 = vld [vmem:[#allocation5 + $0x3a0] ss:$16 sps:$4 sm:$0xff]   ;;  %v3054_v29 = vld [vmem:[#allocation5 + $0x444] ss:$16 sps:$4 sm:$0xff]  }
  0x5b   :  { %1092 = vmatpush1.bf16.msra.mxu0 %v2900_v34  ;;  %1251 = vmatpush1.bf16.msra.mxu1 %v2901_v35  ;;  %v2985_v34 = vld [vmem:[#allocation5 + $0x2cc] ss:$16 sps:$4 sm:$0xff]   ;;  %v73_v35 = vld [vmem:[#allocation2 + $0x50] sm:$0xff] }
  0x5c   :  { %1093 = vmatprep.subr.bf16.mxu0 %v2902_v36  ;;  %1252 = vmatprep.subr.bf16.mxu1 %v2904_v37  ;;  %v78_v36 = vld [vmem:[#allocation2 + $0x78] sm:$0xff] }
  0x5d   :  { %v88_v37 = vpack.c.bf16 %v78_v36, %v73_v35  ;;  %v3060_v36 = vld [vmem:[#allocation5 + $0x464] ss:$16 sps:$4 sm:$0xff]  }
  0x5f   :  { %1094 = vmatpush1.bf16.msra.mxu0 %v2906_v38  ;;  %1253 = vmatpush1.bf16.msra.mxu1 %v2907_v39  ;;  %v2980_v38 = vld [vmem:[#allocation5 + $0x2c0] ss:$16 sps:$4 sm:$0xff]   ;;  %v2983_v39 = vld [vmem:[#allocation5 + $0x2c8] ss:$16 sps:$4 sm:$0xff]  }
  0x60   :  { %1095 = vmatprep.subr.bf16.mxu0 %v2908_v40  ;;  %1254 = vmatprep.subr.bf16.mxu1 %v2910_v41  ;;  %v66_v40 = vld [vmem:[#allocation2 + $0x18] sm:$0xff]  ;;  %v71_v41 = vld [vmem:[#allocation2 + $0x40] sm:$0xff] }
  0x63   :  { %1096 = vmatpush1.bf16.msra.mxu0 %v2912_v42  ;;  %1255 = vmatpush1.bf16.msra.mxu1 %v2913_v43  ;;  %v2988_v42 = vld [vmem:[#allocation5 + $0x2e4] ss:$16 sps:$4 sm:$0xff]   ;;  %v2991_v43 = vld [vmem:[#allocation5 + $0x2ec] ss:$16 sps:$4 sm:$0xff]  }
  0x64   :  { %1097 = vmatprep.subr.bf16.mxu0 %v2914_v44  ;;  %1256 = vmatprep.subr.bf16.mxu1 %v2916_v45  ;;  %v86_v44 = vpack.c.bf16 %v71_v41, %v66_v40  ;;  %v2986_v45 = vld [vmem:[#allocation5 + $0x2e0] ss:$16 sps:$4 sm:$0xff]   ;;  %v3066_v40 = vld [vmem:[#allocation5 + $0x484] ss:$16 sps:$4 sm:$0xff]   ;;  %v3069_v41 = vld [vmem:[#allocation5 + $0x48c] ss:$16 sps:$4 sm:$0xff]  }
  0x67   :  { %1098 = vmatpush1.bf16.msra.mxu0 %v2918_v48  ;;  %1257 = vmatpush1.bf16.msra.mxu1 %v2919_v49  ;;  %v2997_v48 = vld [vmem:[#allocation5 + $0x30c] ss:$16 sps:$4 sm:$0xff]   ;;  %v2992_v49 = vld [vmem:[#allocation5 + $0x300] ss:$16 sps:$4 sm:$0xff]  }
  0x68   :  { %1099 = vmatprep.subr.bf16.mxu0 %v2920_v51  ;;  %1258 = vmatprep.subr.bf16.mxu1 %v2922_v52  ;;  %v3000_v51 = vld [vmem:[#allocation5 + $0x324] ss:$16 sps:$4 sm:$0xff]   ;;  %v3003_v52 = vld [vmem:[#allocation5 + $0x32c] ss:$16 sps:$4 sm:$0xff]  }
  0x6b   :  { %1100 = vmatpush1.bf16.msra.mxu0 %v2924_v53  ;;  %1259 = vmatpush1.bf16.msra.mxu1 %v2925_v54  ;;  %v2998_v53 = vld [vmem:[#allocation5 + $0x320] ss:$16 sps:$4 sm:$0xff]   ;;  %v3001_v54 = vld [vmem:[#allocation5 + $0x328] ss:$16 sps:$4 sm:$0xff]  }
  0x6c   :  { %1101 = vmatprep.subr.bf16.mxu0 %v2926_v55  ;;  %1260 = vmatprep.subr.bf16.mxu1 %v2928_v56  ;;  %v3006_v55 = vld [vmem:[#allocation5 + $0x344] ss:$16 sps:$4 sm:$0xff]   ;;  %v3009_v56 = vld [vmem:[#allocation5 + $0x34c] ss:$16 sps:$4 sm:$0xff]  }
  0x6f   :  { %1102 = vmatpush1.bf16.msra.mxu0 %v2930_v57  ;;  %1261 = vmatpush1.bf16.msra.mxu1 %v2931_v58  ;;  %v3004_v57 = vld [vmem:[#allocation5 + $0x340] ss:$16 sps:$4 sm:$0xff]   ;;  %v3007_v58 = vld [vmem:[#allocation5 + $0x348] ss:$16 sps:$4 sm:$0xff]  }
  0x70   :  { %1103 = vmatprep.subr.bf16.mxu0 %v2932_v59  ;;  %1262 = vmatprep.subr.bf16.mxu1 %v2934_v60  ;;  %v3012_v59 = vld [vmem:[#allocation5 + $0x364] ss:$16 sps:$4 sm:$0xff]   ;;  %v3015_v60 = vld [vmem:[#allocation5 + $0x36c] ss:$16 sps:$4 sm:$0xff]  }
  0x73   :  { %1104 = vmatpush1.bf16.msra.mxu0 %v2936_v61  ;;  %1263 = vmatpush1.bf16.msra.mxu1 %v2937_v62  ;;  %v3010_v61 = vld [vmem:[#allocation5 + $0x360] ss:$16 sps:$4 sm:$0xff]   ;;  %v3013_v62 = vld [vmem:[#allocation5 + $0x368] ss:$16 sps:$4 sm:$0xff]  }
  0x74   :  { %1105 = vmatprep.subr.bf16.mxu0 %v2938_v63  ;;  %1264 = vmatprep.subr.bf16.mxu1 %v2940_v0  ;;  %v3018_v63 = vld [vmem:[#allocation5 + $0x384] ss:$16 sps:$4 sm:$0xff]   ;;  %v3021_v0 = vld [vmem:[#allocation5 + $0x38c] ss:$16 sps:$4 sm:$0xff]  }
  0x77   :  { %1106 = vmatpush1.bf16.msra.mxu0 %v2942_v1  ;;  %1265 = vmatpush1.bf16.msra.mxu1 %v2943_v2  ;;  %v3016_v1 = vld [vmem:[#allocation5 + $0x380] ss:$16 sps:$4 sm:$0xff]   ;;  %v3019_v2 = vld [vmem:[#allocation5 + $0x388] ss:$16 sps:$4 sm:$0xff]  }
  0x78   :  { %1128 = vmatprep.subr.bf16.mxu0 %v2946_v3  ;;  %1287 = vmatprep.subr.bf16.mxu1 %v2949_v6  ;;  %v3024_v3 = vld [vmem:[#allocation5 + $0x3a4] ss:$16 sps:$4 sm:$0xff]   ;;  %v3025_v6 = vld [vmem:[#allocation5 + $0x3a8] ss:$16 sps:$4 sm:$0xff]  }
  0x7a   :  { %1108 = vmatmul.mubr.bf16.vlgmr.msra.gmra.mrb[0].mxu0 %v83_v9  ;;  %1267 = vmatmul.mubr.bf16.vlgmr.msra.gmra.mrb[0].mxu1 %v83_v9  ;;  %v3028_v9 = vld [vmem:[#allocation5 + $0x3c0] ss:$16 sps:$4 sm:$0xff]  }
  0x7b   :  { %1129 = vmatpush1.bf16.msra.mxu0 %v2944_v7  ;;  %1288 = vmatpush1.bf16.msra.mxu1 %v2947_v8  ;;  %v3030_v7 = vld [vmem:[#allocation5 + $0x3c4] ss:$16 sps:$4 sm:$0xff]   ;;  %v3033_v8 = vld [vmem:[#allocation5 + $0x3cc] ss:$16 sps:$4 sm:$0xff]  }
  0x7c   :  { %1130 = vmatprep.subr.bf16.mxu0 %v2952_v10  ;;  %1289 = vmatprep.subr.bf16.mxu1 %v2955_v11  ;;  %v3031_v10 = vld [vmem:[#allocation5 + $0x3c8] ss:$16 sps:$4 sm:$0xff]   ;;  %v3036_v11 = vld [vmem:[#allocation5 + $0x3e4] ss:$16 sps:$4 sm:$0xff]  }
  0x7d   :  { %1117 = vmatprep.mubr.bf16.mxu0 %v89_v31  ;;  %1276 = vmatprep.mubr.bf16.mxu1 %v89_v31  ;;  %v80_v31 = vld [vmem:[#allocation2 + $0x88] sm:$0xff] }
  0x7f   :  { %1131 = vmatpush1.bf16.msra.mxu0 %v2950_v12  ;;  %1290 = vmatpush1.bf16.msra.mxu1 %v2953_v13  ;;  %v3039_v12 = vld [vmem:[#allocation5 + $0x3ec] ss:$16 sps:$4 sm:$0xff]   ;;  %v3034_v13 = vld [vmem:[#allocation5 + $0x3e0] ss:$16 sps:$4 sm:$0xff]  }
  0x80   :  { %1132 = vmatprep.subr.bf16.mxu0 %v2958_v14  ;;  %1291 = vmatprep.subr.bf16.mxu1 %v2961_v15  ;;  %v3037_v14 = vld [vmem:[#allocation5 + $0x3e8] ss:$16 sps:$4 sm:$0xff]   ;;  %v3042_v15 = vld [vmem:[#allocation5 + $0x404] ss:$16 sps:$4 sm:$0xff]  }
  0x82   :  { %1118 = vmatmul.mubr.bf16.gmra.mrb[4].mxu0 %v88_v37  ;;  %1277 = vmatmul.mubr.bf16.gmra.mrb[4].mxu1 %v88_v37  ;;  %v3063_v37 = vld [vmem:[#allocation5 + $0x46c] ss:$16 sps:$4 sm:$0xff]  }
  0x83   :  { %1133 = vmatpush1.bf16.msra.mxu0 %v2956_v16  ;;  %1292 = vmatpush1.bf16.msra.mxu1 %v2959_v17  ;;  %v65_v16 = vld [vmem:[#allocation2 + $0x10] sm:$0xff]  ;;  %v70_v17 = vld [vmem:[#allocation2 + $0x38] sm:$0xff] }
  0x84   :  { %1134 = vmatprep.subr.bf16.mxu0 %v2964_v18  ;;  %1293 = vmatprep.subr.bf16.mxu1 %v2967_v19  ;;  %v3045_v18 = vld [vmem:[#allocation5 + $0x40c] ss:$16 sps:$4 sm:$0xff]   ;;  %v3040_v19 = vld [vmem:[#allocation5 + $0x400] ss:$16 sps:$4 sm:$0xff]  }
  0x85   :  { %1160 = vmatprep.mubr.bf16.mxu0 %v86_v44  ;;  %1319 = vmatprep.mubr.bf16.mxu1 %v86_v44  ;;  %v3067_v44 = vld [vmem:[#allocation5 + $0x488] ss:$16 sps:$4 sm:$0xff]  }
  0x87   :  { %1135 = vmatpush1.bf16.msra.mxu0 %v2962_v20  ;;  %1294 = vmatpush1.bf16.msra.mxu1 %v2965_v21  ;;  %v3043_v20 = vld [vmem:[#allocation5 + $0x408] ss:$16 sps:$4 sm:$0xff]   ;;  %v85_v21 = vpack.c.bf16 %v70_v17, %v65_v16  ;;  %v3117_v16 = vld [vmem:[#allocation7 + $0x8c] ss:$16 sps:$4 sm:$0xff]   ;;  %v3112_v17 = vld [vmem:[#allocation7 + $0x80] ss:$16 sps:$4 sm:$0xff]  }
  0x88   :  { %1136 = vmatprep.subr.bf16.mxu0 %v2970_v22  ;;  %1295 = vmatprep.subr.bf16.mxu1 %v2973_v23  ;;  %v76_v22 = vld [vmem:[#allocation2 + $0x68] sm:$0xff]  ;;  %v81_v23 = vld [vmem:[#allocation2 + $0x90] sm:$0xff] }
  0x89   :  { %v91_v28 = vpack.c.bf16 %v81_v23, %v76_v22  ;;  %v3121_v22 = vld [vmem:[#allocation7 + $0xa8] ss:$16 sps:$4 sm:$0xff]   ;;  %v3126_v23 = vld [vmem:[#allocation7 + $0xc4] ss:$16 sps:$4 sm:$0xff]  }
  0x8b   :  { %1137 = vmatpush1.bf16.msra.mxu0 %v2968_v24  ;;  %1296 = vmatpush1.bf16.msra.mxu1 %v2971_v25  ;;  %v3048_v24 = vld [vmem:[#allocation5 + $0x424] ss:$16 sps:$4 sm:$0xff]   ;;  %v3051_v25 = vld [vmem:[#allocation5 + $0x42c] ss:$16 sps:$4 sm:$0xff]  }
  0x8c   :  { %1138 = vmatprep.subr.bf16.mxu0 %v2976_v26  ;;  %1297 = vmatprep.subr.bf16.mxu1 %v2979_v27  ;;  %v3046_v26 = vld [vmem:[#allocation5 + $0x420] ss:$16 sps:$4 sm:$0xff]   ;;  %v3049_v27 = vld [vmem:[#allocation5 + $0x428] ss:$16 sps:$4 sm:$0xff]  }
  0x8f   :  { %1139 = vmatpush1.bf16.msra.mxu0 %v2974_v30  ;;  %1298 = vmatpush1.bf16.msra.mxu1 %v2977_v32  ;;  %v75_v30 = vld [vmem:[#allocation2 + $0x60] sm:$0xff]  ;;  %v3057_v32 = vld [vmem:[#allocation5 + $0x44c] ss:$16 sps:$4 sm:$0xff]  }
  0x90   :  { %1140 = vmatprep.subr.bf16.mxu0 %v2982_v33  ;;  %1299 = vmatprep.subr.bf16.mxu1 %v2985_v34  ;;  %v3052_v33 = vld [vmem:[#allocation5 + $0x440] ss:$16 sps:$4 sm:$0xff]   ;;  %v3055_v34 = vld [vmem:[#allocation5 + $0x448] ss:$16 sps:$4 sm:$0xff]   ;;  %v90_v35 = vpack.c.bf16 %v80_v31, %v75_v30  ;;  %v3138_v31 = vld [vmem:[#allocation7 + $0x104] ss:$16 sps:$4 sm:$0xff]  }
  0x91   :  { %v3133_v30 = vld [vmem:[#allocation7 + $0xe8] ss:$16 sps:$4 sm:$0xff]  }
  0x93   :  { %1141 = vmatpush1.bf16.msra.mxu0 %v2980_v38  ;;  %1300 = vmatpush1.bf16.msra.mxu1 %v2983_v39  ;;  %v3058_v38 = vld [vmem:[#allocation5 + $0x460] ss:$16 sps:$4 sm:$0xff]   ;;  %v3061_v39 = vld [vmem:[#allocation5 + $0x468] ss:$16 sps:$4 sm:$0xff]  }
  0x94   :  { %1142 = vmatprep.subr.bf16.mxu0 %v2988_v42  ;;  %1301 = vmatprep.subr.bf16.mxu1 %v2991_v43  ;;  %v3381_v42 = vmov 0   ;;  %v3064_v43 = vld [vmem:[#allocation5 + $0x480] ss:$16 sps:$4 sm:$0xff]  }
  0x97   :  { %1143 = vmatpush1.bf16.msra.mxu0 %v2986_v45  ;;  %1302 = vmatpush1.bf16.msra.mxu1 %v2989_v46  ;;  %v3072_v45 = vld [vmem:[#allocation5 + $0x4a4] ss:$16 sps:$4 sm:$0xff]   ;;  %v3075_v46 = vld [vmem:[#allocation5 + $0x4ac] ss:$16 sps:$4 sm:$0xff]  }
  0x98   :  { %1144 = vmatprep.subr.bf16.mxu0 %v2994_v47  ;;  %1303 = vmatprep.subr.bf16.mxu1 %v2997_v48  ;;  %v3070_v47 = vld [vmem:[#allocation5 + $0x4a0] ss:$16 sps:$4 sm:$0xff]   ;;  %v3073_v48 = vld [vmem:[#allocation5 + $0x4a8] ss:$16 sps:$4 sm:$0xff]  }
  0x9b   :  { %1145 = vmatpush1.bf16.msra.mxu0 %v2992_v49  ;;  %1304 = vmatpush1.bf16.msra.mxu1 %v2995_v50  ;;  %v3078_v49 = vld [vmem:[#allocation5 + $0x4c4] ss:$16 sps:$4 sm:$0xff]   ;;  %v3081_v50 = vld [vmem:[#allocation5 + $0x4cc] ss:$16 sps:$4 sm:$0xff]  }
  0x9c   :  { %1146 = vmatprep.subr.bf16.mxu0 %v3000_v51  ;;  %1305 = vmatprep.subr.bf16.mxu1 %v3003_v52  ;;  %v3076_v51 = vld [vmem:[#allocation5 + $0x4c0] ss:$16 sps:$4 sm:$0xff]   ;;  %v3079_v52 = vld [vmem:[#allocation5 + $0x4c8] ss:$16 sps:$4 sm:$0xff]  }
  0x9f   :  { %1147 = vmatpush1.bf16.msra.mxu0 %v2998_v53  ;;  %1306 = vmatpush1.bf16.msra.mxu1 %v3001_v54  ;;  %v3084_v53 = vld [vmem:[#allocation5 + $0x4e4] ss:$16 sps:$4 sm:$0xff]   ;;  %v3087_v54 = vld [vmem:[#allocation5 + $0x4ec] ss:$16 sps:$4 sm:$0xff]  }
  0xa0   :  { %1148 = vmatprep.subr.bf16.mxu0 %v3006_v55  ;;  %1307 = vmatprep.subr.bf16.mxu1 %v3009_v56  ;;  %v3082_v55 = vld [vmem:[#allocation5 + $0x4e0] ss:$16 sps:$4 sm:$0xff]   ;;  %v3085_v56 = vld [vmem:[#allocation5 + $0x4e8] ss:$16 sps:$4 sm:$0xff]  }
  0xa3   :  { %1149 = vmatpush1.bf16.msra.mxu0 %v3004_v57  ;;  %1308 = vmatpush1.bf16.msra.mxu1 %v3007_v58  ;;  %v67_v57 = vld [vmem:[#allocation2 + $0x20] sm:$0xff]  ;;  %v72_v58 = vld [vmem:[#allocation2 + $0x48] sm:$0xff] }
  0xa4   :  { %1150 = vmatprep.subr.bf16.mxu0 %v3012_v59  ;;  %1309 = vmatprep.subr.bf16.mxu1 %v3015_v60  ;;  %v3090_v59 = vld [vmem:[#allocation7 + $0x4] ss:$16 sps:$4 sm:$0xff]   ;;  %v3093_v60 = vld [vmem:[#allocation7 + $0xc] ss:$16 sps:$4 sm:$0xff]  }
  0xa7   :  { %1151 = vmatpush1.bf16.msra.mxu0 %v3010_v61  ;;  %1310 = vmatpush1.bf16.msra.mxu1 %v3013_v62  ;;  %v87_v61 = vpack.c.bf16 %v72_v58, %v67_v57  ;;  %v3088_v62 = vld [vmem:[#allocation7] ss:$16 sps:$4 sm:$0xff]   ;;  %v3175_v58 = vld [vmem:[#allocation7 + $0x1c8] ss:$16 sps:$4 sm:$0xff]  }
  0xa8   :  { %1152 = vmatprep.subr.bf16.mxu0 %v3018_v63  ;;  %1311 = vmatprep.subr.bf16.mxu1 %v3021_v0  ;;  %v3091_v63 = vld [vmem:[#allocation7 + $0x8] ss:$16 sps:$4 sm:$0xff]   ;;  %v3096_v0 = vld [vmem:[#allocation7 + $0x24] ss:$16 sps:$4 sm:$0xff]   ;;  %v3172_v57 = vld [vmem:[#allocation7 + $0x1c0] ss:$16 sps:$4 sm:$0xff]  }
  0xab   :  { %1153 = vmatpush1.bf16.msra.mxu0 %v3016_v1  ;;  %1312 = vmatpush1.bf16.msra.mxu1 %v3019_v2  ;;  %v3099_v1 = vld [vmem:[#allocation7 + $0x2c] ss:$16 sps:$4 sm:$0xff]   ;;  %v77_v2 = vld [vmem:[#allocation2 + $0x70] sm:$0xff] }
  0xac   :  { %1154 = vmatprep.subr.bf16.mxu0 %v3024_v3  ;;  %1313 = vmatprep.subr.bf16.mxu1 %v3027_v4  ;;  %v82_v3 = vld [vmem:[#allocation2 + $0x98] sm:$0xff]  ;;  %v3094_v4 = vld [vmem:[#allocation7 + $0x20] ss:$16 sps:$4 sm:$0xff]  }
  0xaf   :  { %1155 = vmatpush1.bf16.msra.mxu0 %v3022_v5  ;;  %1314 = vmatpush1.bf16.msra.mxu1 %v3025_v6  ;;  %v3097_v5 = vld [vmem:[#allocation7 + $0x28] ss:$16 sps:$4 sm:$0xff]   ;;  %v3102_v6 = vld [vmem:[#allocation7 + $0x44] ss:$16 sps:$4 sm:$0xff]  }
  0xb0   :  { %1156 = vmatprep.subr.bf16.mxu0 %v3030_v7  ;;  %1315 = vmatprep.subr.bf16.mxu1 %v3033_v8  ;;  %v3105_v7 = vld [vmem:[#allocation7 + $0x4c] ss:$16 sps:$4 sm:$0xff]   ;;  %v92_v8 = vpack.c.bf16 %v82_v3, %v77_v2 }
  0xb3   :  { %1157 = vmatpush1.bf16.msra.mxu0 %v3028_v9  ;;  %1316 = vmatpush1.bf16.msra.mxu1 %v3031_v10  ;;  %v3100_v9 = vld [vmem:[#allocation7 + $0x40] ss:$16 sps:$4 sm:$0xff]   ;;  %v3103_v10 = vld [vmem:[#allocation7 + $0x48] ss:$16 sps:$4 sm:$0xff]  }
  0xb4   :  { %1158 = vmatprep.subr.bf16.mxu0 %v3036_v11  ;;  %1317 = vmatprep.subr.bf16.mxu1 %v3039_v12  ;;  %v3108_v11 = vld [vmem:[#allocation7 + $0x64] ss:$16 sps:$4 sm:$0xff]   ;;  %v3111_v12 = vld [vmem:[#allocation7 + $0x6c] ss:$16 sps:$4 sm:$0xff]  }
  0xb7   :  { %1159 = vmatpush1.bf16.msra.mxu0 %v3034_v13  ;;  %1318 = vmatpush1.bf16.msra.mxu1 %v3037_v14  ;;  %v3106_v13 = vld [vmem:[#allocation7 + $0x60] ss:$16 sps:$4 sm:$0xff]   ;;  %v3109_v14 = vld [vmem:[#allocation7 + $0x68] ss:$16 sps:$4 sm:$0xff]  }
  0xb8   :  { %1181 = vmatprep.subr.bf16.mxu0 %v3042_v15  ;;  %1340 = vmatprep.subr.bf16.mxu1 %v3045_v18  ;;  %v3114_v15 = vld [vmem:[#allocation7 + $0x84] ss:$16 sps:$4 sm:$0xff]   ;;  %v3115_v18 = vld [vmem:[#allocation7 + $0x88] ss:$16 sps:$4 sm:$0xff]  }
  0xba   :  { %1161 = vmatmul.mubr.bf16.vlgmr.msra.gmra.mrb[0].mxu0 %v85_v21  ;;  %1320 = vmatmul.mubr.bf16.vlgmr.msra.gmra.mrb[0].mxu1 %v85_v21  ;;  %v3118_v21 = vld [vmem:[#allocation7 + $0xa0] ss:$16 sps:$4 sm:$0xff]  }
  0xbb   :  { %1182 = vmatpush1.bf16.msra.mxu0 %v3040_v19  ;;  %1341 = vmatpush1.bf16.msra.mxu1 %v3043_v20  ;;  %v3120_v19 = vld [vmem:[#allocation7 + $0xa4] ss:$16 sps:$4 sm:$0xff]   ;;  %v3123_v20 = vld [vmem:[#allocation7 + $0xac] ss:$16 sps:$4 sm:$0xff]  }
  0xbc   :  { %1183 = vmatprep.subr.bf16.mxu0 %v3048_v24  ;;  %1342 = vmatprep.subr.bf16.mxu1 %v3051_v25  ;;  %v3129_v24 = vld [vmem:[#allocation7 + $0xcc] ss:$16 sps:$4 sm:$0xff]   ;;  %v3124_v25 = vld [vmem:[#allocation7 + $0xc0] ss:$16 sps:$4 sm:$0xff]  }
  0xbd   :  { %1170 = vmatprep.mubr.bf16.mxu0 %v91_v28  ;;  %1329 = vmatprep.mubr.bf16.mxu1 %v91_v28  ;;  %v3135_v28 = vld [vmem:[#allocation7 + $0xec] ss:$16 sps:$4 sm:$0xff]  }
  0xbf   :  { %1184 = vmatpush1.bf16.msra.mxu0 %v3046_v26  ;;  %1343 = vmatpush1.bf16.msra.mxu1 %v3049_v27  ;;  %v3127_v26 = vld [vmem:[#allocation7 + $0xc8] ss:$16 sps:$4 sm:$0xff]   ;;  %v3132_v27 = vld [vmem:[#allocation7 + $0xe4] ss:$16 sps:$4 sm:$0xff]  }
  0xc0   :  { %1185 = vmatprep.subr.bf16.mxu0 %v3054_v29  ;;  %1344 = vmatprep.subr.bf16.mxu1 %v3057_v32  ;;  %v3130_v29 = vld [vmem:[#allocation7 + $0xe0] ss:$16 sps:$4 sm:$0xff]   ;;  %v3141_v32 = vld [vmem:[#allocation7 + $0x10c] ss:$16 sps:$4 sm:$0xff]  }
  0xc2   :  { %1171 = vmatmul.mubr.bf16.gmra.mrb[4].mxu0 %v90_v35  ;;  %1330 = vmatmul.mubr.bf16.gmra.mrb[4].mxu1 %v90_v35  ;;  %v3144_v35 = vld [vmem:[#allocation7 + $0x124] ss:$16 sps:$4 sm:$0xff]  }
  0xc3   :  { %1186 = vmatpush1.bf16.msra.mxu0 %v3052_v33  ;;  %1345 = vmatpush1.bf16.msra.mxu1 %v3055_v34  ;;  %v3136_v33 = vld [vmem:[#allocation7 + $0x100] ss:$16 sps:$4 sm:$0xff]   ;;  %v3139_v34 = vld [vmem:[#allocation7 + $0x108] ss:$16 sps:$4 sm:$0xff]  }
  0xc4   :  { %1187 = vmatprep.subr.bf16.mxu0 %v3060_v36  ;;  %1346 = vmatprep.subr.bf16.mxu1 %v3063_v37  ;;  %v3147_v36 = vld [vmem:[#allocation7 + $0x12c] ss:$16 sps:$4 sm:$0xff]   ;;  %v3142_v37 = vld [vmem:[#allocation7 + $0x120] ss:$16 sps:$4 sm:$0xff]  }
  0xc5   :  { %1213 = vmatprep.mubr.bf16.mxu0 %v3381_v42  ;;  %1372 = vmatprep.mubr.bf16.mxu1 %v3381_v42 }
  0xc7   :  { %1188 = vmatpush1.bf16.msra.mxu0 %v3058_v38  ;;  %1347 = vmatpush1.bf16.msra.mxu1 %v3061_v39  ;;  %v3145_v38 = vld [vmem:[#allocation7 + $0x128] ss:$16 sps:$4 sm:$0xff]   ;;  %v3150_v39 = vld [vmem:[#allocation7 + $0x144] ss:$16 sps:$4 sm:$0xff]  }
  0xc8   :  { %1189 = vmatprep.subr.bf16.mxu0 %v3066_v40  ;;  %1348 = vmatprep.subr.bf16.mxu1 %v3069_v41  ;;  %v3153_v40 = vld [vmem:[#allocation7 + $0x14c] ss:$16 sps:$4 sm:$0xff]   ;;  %v3148_v41 = vld [vmem:[#allocation7 + $0x140] ss:$16 sps:$4 sm:$0xff]  }
  0xcb   :  { %1190 = vmatpush1.bf16.msra.mxu0 %v3064_v43  ;;  %1349 = vmatpush1.bf16.msra.mxu1 %v3067_v44  ;;  %v3156_v43 = vld [vmem:[#allocation7 + $0x164] ss:$16 sps:$4 sm:$0xff]   ;;  %v3159_v44 = vld [vmem:[#allocation7 + $0x16c] ss:$16 sps:$4 sm:$0xff]  }
  0xcc   :  { %1191 = vmatprep.subr.bf16.mxu0 %v3072_v45  ;;  %1350 = vmatprep.subr.bf16.mxu1 %v3075_v46  ;;  %v3154_v45 = vld [vmem:[#allocation7 + $0x160] ss:$16 sps:$4 sm:$0xff]   ;;  %v3157_v46 = vld [vmem:[#allocation7 + $0x168] ss:$16 sps:$4 sm:$0xff]  }
  0xcf   :  { %1192 = vmatpush1.bf16.msra.mxu0 %v3070_v47  ;;  %1351 = vmatpush1.bf16.msra.mxu1 %v3073_v48  ;;  %v3162_v47 = vld [vmem:[#allocation7 + $0x184] ss:$16 sps:$4 sm:$0xff]   ;;  %v3165_v48 = vld [vmem:[#allocation7 + $0x18c] ss:$16 sps:$4 sm:$0xff]  }
  0xd0   :  { %1193 = vmatprep.subr.bf16.mxu0 %v3078_v49  ;;  %1352 = vmatprep.subr.bf16.mxu1 %v3081_v50  ;;  %v3160_v49 = vld [vmem:[#allocation7 + $0x180] ss:$16 sps:$4 sm:$0xff]   ;;  %v3163_v50 = vld [vmem:[#allocation7 + $0x188] ss:$16 sps:$4 sm:$0xff]  }
  0xd3   :  { %1194 = vmatpush1.bf16.msra.mxu0 %v3076_v51  ;;  %1353 = vmatpush1.bf16.msra.mxu1 %v3079_v52  ;;  %v3168_v51 = vld [vmem:[#allocation7 + $0x1a4] ss:$16 sps:$4 sm:$0xff]   ;;  %v3171_v52 = vld [vmem:[#allocation7 + $0x1ac] ss:$16 sps:$4 sm:$0xff]  }
  0xd4   :  { %1195 = vmatprep.subr.bf16.mxu0 %v3084_v53  ;;  %1354 = vmatprep.subr.bf16.mxu1 %v3087_v54  ;;  %v3166_v53 = vld [vmem:[#allocation7 + $0x1a0] ss:$16 sps:$4 sm:$0xff]   ;;  %v3169_v54 = vld [vmem:[#allocation7 + $0x1a8] ss:$16 sps:$4 sm:$0xff]  }
  0xd7   :  { %1196 = vmatpush1.bf16.msra.mxu0 %v3082_v55  ;;  %1355 = vmatpush1.bf16.msra.mxu1 %v3085_v56  ;;  %v3174_v55 = vld [vmem:[#allocation7 + $0x1c4] ss:$16 sps:$4 sm:$0xff]   ;;  %v3177_v56 = vld [vmem:[#allocation7 + $0x1cc] ss:$16 sps:$4 sm:$0xff]  }
  0xd8   :  { %2223 = vmatprep.subr.bf16.mxu0 %v3090_v59  ;;  %2329 = vmatprep.subr.bf16.mxu1 %v3093_v60  ;;  %v3180_v59 = vld [vmem:[#allocation7 + $0x1e4] ss:$16 sps:$4 sm:$0xff]   ;;  %v3183_v60 = vld [vmem:[#allocation7 + $0x1ec] ss:$16 sps:$4 sm:$0xff]  }
  0xda   :  { %1214 = vmatmul.mubr.bf16.vlgmr.msra.gmra.mrb[0].mxu0 %v87_v61  ;;  %1373 = vmatmul.mubr.bf16.vlgmr.msra.gmra.mrb[0].mxu1 %v87_v61  ;;  %v3178_v61 = vld [vmem:[#allocation7 + $0x1e0] ss:$16 sps:$4 sm:$0xff]  }
  0xdb   :  { %1223 = vmatprep.mubr.bf16.mxu0 %v3381_v42  ;;  %1382 = vmatprep.mubr.bf16.mxu1 %v3381_v42  ;;  %v3151_v42 = vld [vmem:[#allocation7 + $0x148] ss:$16 sps:$4 sm:$0xff]  }
  0xdc   :  { %2224 = vmatpush1.bf16.msra.mxu0 %v3088_v62  ;;  %2330 = vmatpush1.bf16.msra.mxu1 %v3091_v63  ;;  %v3181_v62 = vld [vmem:[#allocation7 + $0x1e8] ss:$16 sps:$4 sm:$0xff]   ;;  %v3186_v63 = vld [vmem:[#allocation7 + $0x204] ss:$16 sps:$4 sm:$0xff]  }
  0xdd   :  { %2225 = vmatprep.subr.bf16.mxu0 %v3096_v0  ;;  %2331 = vmatprep.subr.bf16.mxu1 %v3099_v1  ;;  %v3189_v0 = vld [vmem:[#allocation7 + $0x20c] ss:$16 sps:$4 sm:$0xff]   ;;  %v255_v1 = vlaneseq }
  0xdf   :  { %v3457_v2 = vshrl.u32 %v255_v1, 7 }
  0xe0   :  { %2226 = vmatpush1.bf16.msra.mxu0 %v3094_v4  ;;  %2332 = vmatpush1.bf16.msra.mxu1 %v3097_v5  ;;  %v253_v5 = vld [vmem:[%s3511_s2] sm:$0xf] }
  0xe1   :  { %2227 = vmatprep.subr.bf16.mxu0 %v3102_v6  ;;  %2333 = vmatprep.subr.bf16.mxu1 %v3105_v7  ;;  %v257_v3 = vsub.s32 0, %v3457_v2  ;;  %v265_v4 = vsub.s32 2, %v3457_v2  ;;  %v261_v6 = vsub.s32 1, %v3457_v2  ;;  %v269_v7 = vsub.s32 3, %v3457_v2 }
  0xe2   :  { %1224 = vmatmul.mubr.bf16.gmra.mrb[4].mxu0 %v92_v8  ;;  %1383 = vmatmul.mubr.bf16.gmra.mrb[4].mxu1 %v92_v8 }
  0xe3   :  { %v258_v8 = vrot.slane %v253_v5, %v257_v3 }
  0xe4   :  { %2228 = vmatpush1.bf16.msra.mxu0 %v3100_v9  ;;  %2334 = vmatpush1.bf16.msra.mxu1 %v3103_v10  ;;  %v266_v9 = vrot.slane %v253_v5, %v265_v4  ;;  %v262_v10 = vrot.slane %v253_v5, %v261_v6 }
  0xe5   :  { %2229 = vmatprep.subr.bf16.mxu0 %v3108_v11  ;;  %2335 = vmatprep.subr.bf16.mxu1 %v3111_v12  ;;  %v270_v11 = vrot.slane %v253_v5, %v269_v7 }
  0xe8   :  { %2230 = vmatpush1.bf16.msra.mxu0 %v3106_v13  ;;  %2336 = vmatpush1.bf16.msra.mxu1 %v3109_v14 }
  0xe9   :  { %2231 = vmatprep.subr.bf16.mxu0 %v3114_v15  ;;  %2337 = vmatprep.subr.bf16.mxu1 %v3117_v16 }
  0xec   :  { %2232 = vmatpush1.bf16.msra.mxu0 %v3112_v17  ;;  %2338 = vmatpush1.bf16.msra.mxu1 %v3115_v18 }
  0xed   :  { %2233 = vmatprep.subr.bf16.mxu0 %v3120_v19  ;;  %2339 = vmatprep.subr.bf16.mxu1 %v3123_v20 }
  0xf0   :  { %2234 = vmatpush1.bf16.msra.mxu0 %v3118_v21  ;;  %2340 = vmatpush1.bf16.msra.mxu1 %v3121_v22 }
  0xf1   :  { %2235 = vmatprep.subr.bf16.mxu0 %v3126_v23  ;;  %2341 = vmatprep.subr.bf16.mxu1 %v3129_v24 }
  0xf4   :  { %2236 = vmatpush1.bf16.msra.mxu0 %v3124_v25  ;;  %2342 = vmatpush1.bf16.msra.mxu1 %v3127_v26 }
  0xf5   :  { %2237 = vmatprep.subr.bf16.mxu0 %v3132_v27  ;;  %2343 = vmatprep.subr.bf16.mxu1 %v3135_v28 }
  0xf8   :  { %2238 = vmatpush1.bf16.msra.mxu0 %v3130_v29  ;;  %2344 = vmatpush1.bf16.msra.mxu1 %v3133_v30 }
  0xf9   :  { %2239 = vmatprep.subr.bf16.mxu0 %v3138_v31  ;;  %2345 = vmatprep.subr.bf16.mxu1 %v3141_v32 }
  0xfc   :  { %2240 = vmatpush1.bf16.msra.mxu0 %v3136_v33  ;;  %2346 = vmatpush1.bf16.msra.mxu1 %v3139_v34 }
  0xfd   :  { %2241 = vmatprep.subr.bf16.mxu0 %v3144_v35  ;;  %2347 = vmatprep.subr.bf16.mxu1 %v3147_v36 }
 0x100   :  { %2242 = vmatpush1.bf16.msra.mxu0 %v3142_v37  ;;  %2348 = vmatpush1.bf16.msra.mxu1 %v3145_v38 }
 0x101   :  { %2243 = vmatprep.subr.bf16.mxu0 %v3150_v39  ;;  %2349 = vmatprep.subr.bf16.mxu1 %v3153_v40 }
 0x104   :  { %2244 = vmatpush1.bf16.msra.mxu0 %v3148_v41  ;;  %2350 = vmatpush1.bf16.msra.mxu1 %v3151_v42 }
 0x105   :  { %2245 = vmatprep.subr.bf16.mxu0 %v3156_v43  ;;  %2351 = vmatprep.subr.bf16.mxu1 %v3159_v44 }
 0x108   :  { %2246 = vmatpush1.bf16.msra.mxu0 %v3154_v45  ;;  %2352 = vmatpush1.bf16.msra.mxu1 %v3157_v46 }
 0x109   :  { %2247 = vmatprep.subr.bf16.mxu0 %v3162_v47  ;;  %2353 = vmatprep.subr.bf16.mxu1 %v3165_v48 }
 0x10c   :  { %2248 = vmatpush1.bf16.msra.mxu0 %v3160_v49  ;;  %2354 = vmatpush1.bf16.msra.mxu1 %v3163_v50  ;;  %v3184_v50 = vld [vmem:[#allocation7 + $0x200] ss:$16 sps:$4 sm:$0xff]  }
 0x10d   :  { %2249 = vmatprep.subr.bf16.mxu0 %v3168_v51  ;;  %2355 = vmatprep.subr.bf16.mxu1 %v3171_v52  ;;  %v3187_v51 = vld [vmem:[#allocation7 + $0x208] ss:$16 sps:$4 sm:$0xff]  }
 0x110   :  { %2250 = vmatpush1.bf16.msra.mxu0 %v3166_v53  ;;  %2356 = vmatpush1.bf16.msra.mxu1 %v3169_v54 }
 0x111   :  { %2251 = vmatprep.subr.bf16.mxu0 %v3174_v55  ;;  %2357 = vmatprep.subr.bf16.mxu1 %v3177_v56 }
 0x114   :  { %2252 = vmatpush1.bf16.msra.mxu0 %v3172_v57  ;;  %2358 = vmatpush1.bf16.msra.mxu1 %v3175_v58  ;;  %v3192_v57 = vld [vmem:[#allocation7 + $0x224] ss:$16 sps:$4 sm:$0xff]   ;;  %v3195_v58 = vld [vmem:[#allocation7 + $0x22c] ss:$16 sps:$4 sm:$0xff]  }
 0x115   :  { %2253 = vmatprep.subr.bf16.mxu0 %v3180_v59  ;;  %2359 = vmatprep.subr.bf16.mxu1 %v3183_v60 }
 0x118   :  { %2254 = vmatpush1.bf16.msra.mxu0 %v3178_v61  ;;  %2360 = vmatpush1.bf16.msra.mxu1 %v3181_v62 }
 0x119   :  { %2276 = vmatprep.subr.bf16.mxu0 %v3186_v63  ;;  %2382 = vmatprep.subr.bf16.mxu1 %v3189_v0 }
 0x1ad   :  { %v1215_v12 = vpop.f32.mrb[0].mxu0  ;;  %v1374_v13 = vpop.f32.mrb[0].mxu1 }
 0x1ae   :  { %v2757_v14 = vadd.f32 %v1215_v12, %v258_v8  ;;  %v2765_v15 = vadd.f32 %v1374_v13, %v266_v9  ;;  %v1217_v16 = vpop.f32.mrb[1].mxu0  ;;  %v1376_v17 = vpop.f32.mrb[1].mxu1 }
 0x1af   :  { %v2758_v18 = vadd.f32 %v1217_v16, %v262_v10  ;;  %v2766_v19 = vadd.f32 %v1376_v17, %v270_v11  ;;  %v1219_v20 = vpop.f32.mrb[2].mxu0  ;;  %v1378_v21 = vpop.f32.mrb[2].mxu1 }
 0x1b0   :  { %v1393_v22 = vmul.f32 0.2, %v2757_v14  ;;  %v1395_v23 = vmul.f32 0.2, %v2765_v15  ;;  %v2759_v24 = vadd.f32 %v1219_v20, %v258_v8  ;;  %v2767_v25 = vadd.f32 %v1378_v21, %v266_v9  ;;  %v1221_v26 = vpop.f32.mrb[3].mxu0  ;;  %v1380_v27 = vpop.f32.mrb[3].mxu1 }
 0x1b1   :  { %v1394_v28 = vmul.f32 0.2, %v2758_v18  ;;  %v1396_v29 = vmul.f32 0.2, %v2766_v19  ;;  %v2760_v30 = vadd.f32 %v1221_v26, %v262_v10  ;;  %v2768_v31 = vadd.f32 %v1380_v27, %v270_v11 }
 0x1b2   :  { %v1397_v32 = vmul.f32 0.2, %v2759_v24  ;;  %v1399_v33 = vmul.f32 0.2, %v2767_v25  ;;  %v1409_v36 = vmax.f32 %v2757_v14, %v1393_v22  ;;  %v1411_v37 = vmax.f32 %v2765_v15, %v1395_v23 }
 0x1b3   :  { %v1398_v34 = vmul.f32 0.2, %v2760_v30  ;;  %v1400_v35 = vmul.f32 0.2, %v2768_v31  ;;  %v1410_v40 = vmax.f32 %v2758_v18, %v1394_v28  ;;  %v1412_v41 = vmax.f32 %v2766_v19, %v1396_v29  ;;  %v3190_v18 = vld [vmem:[#allocation7 + $0x220] ss:$16 sps:$4 sm:$0xff]  }
 0x1b4   :  { %v1413_v38 = vmax.f32 %v2759_v24, %v1397_v32  ;;  %v1415_v39 = vmax.f32 %v2767_v25, %v1399_v33  ;;  %v3201_v25 = vld [vmem:[#allocation7 + $0x24c] ss:$16 sps:$4 sm:$0xff]   ;;  %v3196_v32 = vld [vmem:[#allocation7 + $0x240] ss:$16 sps:$4 sm:$0xff]   ;;  %v3199_v33 = vld [vmem:[#allocation7 + $0x248] ss:$16 sps:$4 sm:$0xff]  }
 0x1b5   :  { %v1414_v42 = vmax.f32 %v2760_v30, %v1398_v34  ;;  %v1416_v43 = vmax.f32 %v2768_v31, %v1400_v35  ;;  %v1225_v44 = vpop.f32.mrb[4].mxu0  ;;  %v1384_v45 = vpop.f32.mrb[4].mxu1  ;;  %v3204_v35 = vld [vmem:[#allocation7 + $0x264] ss:$16 sps:$4 sm:$0xff]  }
 0x1b6   :  { %v1425_v46 = vpack.c.bf16 %v1413_v38, %v1409_v36  ;;  %v3474_v47 = vpack.c.bf16 %v1415_v39, %v1411_v37  ;;  %v2761_v48 = vadd.f32 %v1225_v44, %v258_v8  ;;  %v1227_v49 = vpop.f32.mrb[5].mxu0  ;;  %v2769_v52 = vadd.f32 %v1384_v45, %v266_v9  ;;  %v1386_v53 = vpop.f32.mrb[5].mxu1  ;;  %v3207_v36 = vld [vmem:[#allocation7 + $0x26c] ss:$16 sps:$4 sm:$0xff]   ;;  %v3202_v37 = vld [vmem:[#allocation7 + $0x260] ss:$16 sps:$4 sm:$0xff]  }
 0x1b7   :  { %v2762_v54 = vadd.f32 %v1227_v49, %v262_v10  ;;  %v1229_v55 = vpop.f32.mrb[6].mxu0  ;;  %v1426_v56 = vpack.c.bf16 %v1414_v42, %v1410_v40  ;;  %v2770_v59 = vadd.f32 %v1386_v53, %v270_v11  ;;  %v1388_v60 = vpop.f32.mrb[6].mxu1  ;;  %v1428_v61 = vpack.c.bf16 %v1416_v43, %v1412_v41  ;;  %v3205_v38 = vld [vmem:[#allocation7 + $0x268] ss:$16 sps:$4 sm:$0xff]   ;;  %v3210_v39 = vld [vmem:[#allocation7 + $0x284] ss:$16 sps:$4 sm:$0xff]  }
 0x1b8   :  { %v1401_v62 = vmul.f32 0.2, %v2761_v48  ;;  %v2763_v63 = vadd.f32 %v1229_v55, %v258_v8  ;;  %v1231_v0 = vpop.f32.mrb[7].mxu0  ;;  %v1403_v1 = vmul.f32 0.2, %v2769_v52  ;;  %v2771_v5 = vadd.f32 %v1388_v60, %v266_v9  ;;  %v1390_v12 = vpop.f32.mrb[7].mxu1 }
 0x1b9   :  { %v1402_v13 = vmul.f32 0.2, %v2762_v54  ;;  %v2764_v14 = vadd.f32 %v1231_v0, %v262_v10  ;;  %2255 = vmatprep.mubr.bf16.mxu0 %v1426_v56  ;;  %2361 = vmatprep.mubr.bf16.mxu1 %v1426_v56  ;;  %v1404_v15 = vmul.f32 0.2, %v2770_v59  ;;  %v2772_v16 = vadd.f32 %v1390_v12, %v270_v11  ;;  %v3193_v8 = vld [vmem:[#allocation7 + $0x228] ss:$16 sps:$4 sm:$0xff]  }
 0x1ba   :  { %v1405_v17 = vmul.f32 0.2, %v2763_v63  ;;  %2256 = vmatmul.mubr.bf16.vlgmr.msra.gmra.mrb[8].mxu0 %v1425_v46  ;;  %2362 = vmatmul.mubr.bf16.vlgmr.msra.gmra.mrb[8].mxu1 %v1425_v46  ;;  %v1419_v19 = vmax.f32 %v2769_v52, %v1403_v1  ;;  %v1407_v20 = vmul.f32 0.2, %v2771_v5  ;;  %v1417_v9 = vmax.f32 %v2761_v48, %v1401_v62  ;;  %v3198_v10 = vld [vmem:[#allocation7 + $0x244] ss:$16 sps:$4 sm:$0xff]  }
 0x1bb   :  { %v1406_v21 = vmul.f32 0.2, %v2764_v14  ;;  %2277 = vmatpush1.bf16.msra.mxu0 %v3184_v50  ;;  %2383 = vmatpush1.bf16.msra.mxu1 %v3187_v51  ;;  %v1420_v22 = vmax.f32 %v2770_v59, %v1404_v15  ;;  %v1408_v23 = vmul.f32 0.2, %v2772_v16  ;;  %v1418_v11 = vmax.f32 %v2762_v54, %v1402_v13  ;;  %v3213_v40 = vld [vmem:[#allocation7 + $0x28c] ss:$16 sps:$4 sm:$0xff]  }
 0x1bc   :  { %v1421_v24 = vmax.f32 %v2763_v63, %v1405_v17  ;;  %2278 = vmatprep.subr.bf16.mxu0 %v3192_v57  ;;  %2384 = vmatprep.subr.bf16.mxu1 %v3195_v58  ;;  %v1423_v26 = vmax.f32 %v2771_v5, %v1407_v20  ;;  %v3208_v41 = vld [vmem:[#allocation7 + $0x280] ss:$16 sps:$4 sm:$0xff]   ;;  %v3211_v42 = vld [vmem:[#allocation7 + $0x288] ss:$16 sps:$4 sm:$0xff]   ;;  %v3216_v43 = vld [vmem:[#allocation7 + $0x2a4] ss:$16 sps:$4 sm:$0xff]  }
 0x1bd   :  { %v1422_v27 = vmax.f32 %v2764_v14, %v1406_v21  ;;  %v1424_v28 = vmax.f32 %v2772_v16, %v1408_v23  ;;  %v3219_v44 = vld [vmem:[#allocation7 + $0x2ac] ss:$16 sps:$4 sm:$0xff]   ;;  %v3214_v45 = vld [vmem:[#allocation7 + $0x2a0] ss:$16 sps:$4 sm:$0xff]   ;;  %v3217_v46 = vld [vmem:[#allocation7 + $0x2a8] ss:$16 sps:$4 sm:$0xff]  }
 0x1be   :  { %v1429_v29 = vpack.c.bf16 %v1421_v24, %v1417_v9  ;;  %v3476_v30 = vpack.c.bf16 %v1423_v26, %v1419_v19  ;;  %v3222_v48 = vld [vmem:[#allocation7 + $0x2c4] ss:$16 sps:$4 sm:$0xff]   ;;  %v3225_v49 = vld [vmem:[#allocation7 + $0x2cc] ss:$16 sps:$4 sm:$0xff]   ;;  %v3220_v50 = vld [vmem:[#allocation7 + $0x2c0] ss:$16 sps:$4 sm:$0xff]  }
 0x1bf   :  { %2279 = vmatpush1.bf16.msra.mxu0 %v3190_v18  ;;  %2385 = vmatpush1.bf16.msra.mxu1 %v3193_v8  ;;  %v1430_v31 = vpack.c.bf16 %v1422_v27, %v1418_v11  ;;  %v3478_v34 = vpack.c.bf16 %v1424_v28, %v1420_v22  ;;  %v3223_v51 = vld [vmem:[#allocation7 + $0x2c8] ss:$16 sps:$4 sm:$0xff]   ;;  %v3228_v52 = vld [vmem:[#allocation7 + $0x2e4] ss:$16 sps:$4 sm:$0xff]   ;;  %v3231_v53 = vld [vmem:[#allocation7 + $0x2ec] ss:$16 sps:$4 sm:$0xff]  }
 0x1c0   :  { %2280 = vmatprep.subr.bf16.mxu0 %v3198_v10  ;;  %2386 = vmatprep.subr.bf16.mxu1 %v3201_v25  ;;  %v3226_v54 = vld [vmem:[#allocation7 + $0x2e0] ss:$16 sps:$4 sm:$0xff]   ;;  %v3229_v55 = vld [vmem:[#allocation7 + $0x2e8] ss:$16 sps:$4 sm:$0xff]   ;;  %v3234_v56 = vld [vmem:[#allocation7 + $0x304] ss:$16 sps:$4 sm:$0xff]  }
 0x1c1   :  { %2265 = vmatprep.mubr.bf16.mxu0 %v1430_v31  ;;  %2371 = vmatprep.mubr.bf16.mxu1 %v1430_v31  ;;  %v3237_v57 = vld [vmem:[#allocation7 + $0x30c] ss:$16 sps:$4 sm:$0xff]   ;;  %v3232_v58 = vld [vmem:[#allocation7 + $0x300] ss:$16 sps:$4 sm:$0xff]   ;;  %v3235_v59 = vld [vmem:[#allocation7 + $0x308] ss:$16 sps:$4 sm:$0xff]  }
 0x1c2   :  { %2266 = vmatmul.mubr.bf16.gmra.mrb[12].mxu0 %v1429_v29  ;;  %2372 = vmatmul.mubr.bf16.gmra.mrb[12].mxu1 %v1429_v29  ;;  %v3240_v60 = vld [vmem:[#allocation7 + $0x324] ss:$16 sps:$4 sm:$0xff]   ;;  %v3238_v62 = vld [vmem:[#allocation7 + $0x320] ss:$16 sps:$4 sm:$0xff]   ;;  %v3241_v63 = vld [vmem:[#allocation7 + $0x328] ss:$16 sps:$4 sm:$0xff]  }
 0x1c3   :  { %2281 = vmatpush1.bf16.msra.mxu0 %v3196_v32  ;;  %2387 = vmatpush1.bf16.msra.mxu1 %v3199_v33  ;;  %v3246_v0 = vld [vmem:[#allocation7 + $0x344] ss:$16 sps:$4 sm:$0xff]   ;;  %v3249_v1 = vld [vmem:[#allocation7 + $0x34c] ss:$16 sps:$4 sm:$0xff]   ;;  %v3244_v5 = vld [vmem:[#allocation7 + $0x340] ss:$16 sps:$4 sm:$0xff]  }
 0x1c4   :  { %2308 = vmatprep.mubr.bf16.mxu0 %v1428_v61  ;;  %2414 = vmatprep.mubr.bf16.mxu1 %v1428_v61  ;;  %v3243_v61 = vld [vmem:[#allocation7 + $0x32c] ss:$16 sps:$4 sm:$0xff]   ;;  %v3247_v12 = vld [vmem:[#allocation7 + $0x348] ss:$16 sps:$4 sm:$0xff]   ;;  %v3252_v13 = vld [vmem:[#allocation7 + $0x364] ss:$16 sps:$4 sm:$0xff]  }
 0x1c5   :  { %2282 = vmatprep.subr.bf16.mxu0 %v3204_v35  ;;  %2388 = vmatprep.subr.bf16.mxu1 %v3207_v36  ;;  %v3255_v14 = vld [vmem:[#allocation7 + $0x36c] ss:$16 sps:$4 sm:$0xff]   ;;  %v3250_v15 = vld [vmem:[#allocation7 + $0x360] ss:$16 sps:$4 sm:$0xff]   ;;  %v3253_v16 = vld [vmem:[#allocation7 + $0x368] ss:$16 sps:$4 sm:$0xff]  }
 0x1c6   :  { %v3258_v17 = vld [vmem:[#allocation7 + $0x384] ss:$16 sps:$4 sm:$0xff]   ;;  %v3261_v18 = vld [vmem:[#allocation7 + $0x38c] ss:$16 sps:$4 sm:$0xff]   ;;  %v3256_v19 = vld [vmem:[#allocation7 + $0x380] ss:$16 sps:$4 sm:$0xff]  }
 0x1c7   :  { %2283 = vmatpush1.bf16.msra.mxu0 %v3202_v37  ;;  %2389 = vmatpush1.bf16.msra.mxu1 %v3205_v38  ;;  %v3259_v20 = vld [vmem:[#allocation7 + $0x388] ss:$16 sps:$4 sm:$0xff]   ;;  %v3264_v21 = vld [vmem:[#allocation7 + $0x3a4] ss:$16 sps:$4 sm:$0xff]   ;;  %v3267_v8 = vld [vmem:[#allocation7 + $0x3ac] ss:$16 sps:$4 sm:$0xff]  }
 0x1c8   :  { %2284 = vmatprep.subr.bf16.mxu0 %v3210_v39  ;;  %2390 = vmatprep.subr.bf16.mxu1 %v3213_v40  ;;  %v3262_v22 = vld [vmem:[#allocation7 + $0x3a0] ss:$16 sps:$4 sm:$0xff]   ;;  %v3265_v23 = vld [vmem:[#allocation7 + $0x3a8] ss:$16 sps:$4 sm:$0xff]   ;;  %v3270_v9 = vld [vmem:[#allocation7 + $0x3c4] ss:$16 sps:$4 sm:$0xff]  }
 0x1c9   :  { %v3273_v24 = vld [vmem:[#allocation7 + $0x3cc] ss:$16 sps:$4 sm:$0xff]   ;;  %v3268_v10 = vld [vmem:[#allocation7 + $0x3c0] ss:$16 sps:$4 sm:$0xff]   ;;  %v3271_v25 = vld [vmem:[#allocation7 + $0x3c8] ss:$16 sps:$4 sm:$0xff]  }
 0x1ca   :  { %v3276_v26 = vld [vmem:[#allocation7 + $0x3e4] ss:$16 sps:$4 sm:$0xff]   ;;  %v3279_v11 = vld [vmem:[#allocation7 + $0x3ec] ss:$16 sps:$4 sm:$0xff]   ;;  %v3274_v27 = vld [vmem:[#allocation7 + $0x3e0] ss:$16 sps:$4 sm:$0xff]  }
 0x1cb   :  { %2285 = vmatpush1.bf16.msra.mxu0 %v3208_v41  ;;  %2391 = vmatpush1.bf16.msra.mxu1 %v3211_v42  ;;  %v3277_v28 = vld [vmem:[#allocation7 + $0x3e8] ss:$16 sps:$4 sm:$0xff]   ;;  %v1561_v29 = vld [vmem:[%s3513_s4] sm:$0xf] }
 0x1cc   :  { %2286 = vmatprep.subr.bf16.mxu0 %v3216_v43  ;;  %2392 = vmatprep.subr.bf16.mxu1 %v3219_v44  ;;  %v1566_v31 = vrot.slane %v1561_v29, %v257_v3  ;;  %v1574_v32 = vrot.slane %v1561_v29, %v265_v4  ;;  %v1578_v33 = vrot.slane %v1561_v29, %v269_v7 }
 0x1cf   :  { %2287 = vmatpush1.bf16.msra.mxu0 %v3214_v45  ;;  %2393 = vmatpush1.bf16.msra.mxu1 %v3217_v46 }
 0x1d0   :  { %2288 = vmatprep.subr.bf16.mxu0 %v3222_v48  ;;  %2394 = vmatprep.subr.bf16.mxu1 %v3225_v49 }
 0x1d3   :  { %2289 = vmatpush1.bf16.msra.mxu0 %v3220_v50  ;;  %2395 = vmatpush1.bf16.msra.mxu1 %v3223_v51 }
 0x1d4   :  { %2290 = vmatprep.subr.bf16.mxu0 %v3228_v52  ;;  %2396 = vmatprep.subr.bf16.mxu1 %v3231_v53 }
 0x1d7   :  { %2291 = vmatpush1.bf16.msra.mxu0 %v3226_v54  ;;  %2397 = vmatpush1.bf16.msra.mxu1 %v3229_v55 }
 0x1d8   :  { %2292 = vmatprep.subr.bf16.mxu0 %v3234_v56  ;;  %2398 = vmatprep.subr.bf16.mxu1 %v3237_v57 }
 0x1db   :  { %2293 = vmatpush1.bf16.msra.mxu0 %v3232_v58  ;;  %2399 = vmatpush1.bf16.msra.mxu1 %v3235_v59 }
 0x1dc   :  { %2294 = vmatprep.subr.bf16.mxu0 %v3240_v60  ;;  %2400 = vmatprep.subr.bf16.mxu1 %v3243_v61 }
 0x1df   :  { %2295 = vmatpush1.bf16.msra.mxu0 %v3238_v62  ;;  %2401 = vmatpush1.bf16.msra.mxu1 %v3241_v63 }
 0x1e0   :  { %2296 = vmatprep.subr.bf16.mxu0 %v3246_v0  ;;  %2402 = vmatprep.subr.bf16.mxu1 %v3249_v1 }
 0x1e3   :  { %2297 = vmatpush1.bf16.msra.mxu0 %v3244_v5  ;;  %2403 = vmatpush1.bf16.msra.mxu1 %v3247_v12 }
 0x1e4   :  { %2298 = vmatprep.subr.bf16.mxu0 %v3252_v13  ;;  %2404 = vmatprep.subr.bf16.mxu1 %v3255_v14 }
 0x1e7   :  { %2299 = vmatpush1.bf16.msra.mxu0 %v3250_v15  ;;  %2405 = vmatpush1.bf16.msra.mxu1 %v3253_v16 }
 0x1e8   :  { %2300 = vmatprep.subr.bf16.mxu0 %v3258_v17  ;;  %2406 = vmatprep.subr.bf16.mxu1 %v3261_v18 }
 0x1eb   :  { %2301 = vmatpush1.bf16.msra.mxu0 %v3256_v19  ;;  %2407 = vmatpush1.bf16.msra.mxu1 %v3259_v20 }
 0x1ec   :  { %2302 = vmatprep.subr.bf16.mxu0 %v3264_v21  ;;  %2408 = vmatprep.subr.bf16.mxu1 %v3267_v8 }
 0x1ef   :  { %2303 = vmatpush1.bf16.msra.mxu0 %v3262_v22  ;;  %2409 = vmatpush1.bf16.msra.mxu1 %v3265_v23 }
 0x1f0   :  { %2304 = vmatprep.subr.bf16.mxu0 %v3270_v9  ;;  %2410 = vmatprep.subr.bf16.mxu1 %v3273_v24 }
 0x1f3   :  { %2305 = vmatpush1.bf16.msra.mxu0 %v3268_v10  ;;  %2411 = vmatpush1.bf16.msra.mxu1 %v3271_v25 }
 0x1f4   :  { %2306 = vmatprep.subr.bf16.mxu0 %v3276_v26  ;;  %2412 = vmatprep.subr.bf16.mxu1 %v3279_v11 }
 0x1f7   :  { %2307 = vmatpush1.bf16.msra.mxu0 %v3274_v27  ;;  %2413 = vmatpush1.bf16.msra.mxu1 %v3277_v28 }
 0x1fa   :  { %2309 = vmatmul.mubr.bf16.vlgmr.msra.gmra.mrb[8].mxu0 %v3474_v47  ;;  %2415 = vmatmul.mubr.bf16.vlgmr.msra.gmra.mrb[8].mxu1 %v3474_v47  ;;  %v1570_v47 = vrot.slane %v1561_v29, %v261_v6 }
 0x1fb   :  { %2318 = vmatprep.mubr.bf16.mxu0 %v3478_v34  ;;  %2424 = vmatprep.mubr.bf16.mxu1 %v3478_v34 }
 0x202   :  { %2319 = vmatmul.mubr.bf16.gmra.mrb[12].mxu0 %v3476_v30  ;;  %2425 = vmatmul.mubr.bf16.gmra.mrb[12].mxu1 %v3476_v30 }
 0x2cd   :  { %v2310_v34 = vpop.f32.mrb[8].mxu0  ;;  %v2416_v35 = vpop.f32.mrb[8].mxu1 }
 0x2ce   :  { %v2773_v36 = vadd.f32 %v2310_v34, %v1566_v31  ;;  %v2781_v30 = vadd.f32 %v2416_v35, %v1574_v32  ;;  %v2312_v37 = vpop.f32.mrb[9].mxu0  ;;  %v2418_v38 = vpop.f32.mrb[9].mxu1 }
 0x2cf   :  { %v2774_v39 = vadd.f32 %v2312_v37, %v1570_v47  ;;  %v2782_v40 = vadd.f32 %v2418_v38, %v1578_v33  ;;  %v2314_v41 = vpop.f32.mrb[10].mxu0  ;;  %v2420_v42 = vpop.f32.mrb[10].mxu1 }
 0x2d0   :  { %2435 = vst [vmem:[#allocation8] sm:$0xff] %v2773_v36  ;;  %2437 = vst [vmem:[#allocation8 + $0x10] sm:$0xff] %v2781_v30  ;;  %v2775_v3 = vadd.f32 %v2314_v41, %v1566_v31  ;;  %v2783_v4 = vadd.f32 %v2420_v42, %v1574_v32  ;;  %v2316_v43 = vpop.f32.mrb[11].mxu0  ;;  %v2422_v44 = vpop.f32.mrb[11].mxu1 }
 0x2d1   :  { %2436 = vst [vmem:[#allocation8 + $0x8] sm:$0xff] %v2774_v39  ;;  %2438 = vst [vmem:[#allocation8 + $0x18] sm:$0xff] %v2782_v40  ;;  %v2776_v2 = vadd.f32 %v2316_v43, %v1570_v47  ;;  %v2784_v6 = vadd.f32 %v2422_v44, %v1578_v33 }
 0x2d2   :  { %2439 = vst [vmem:[#allocation8 + $0x20] sm:$0xff] %v2775_v3  ;;  %2441 = vst [vmem:[#allocation8 + $0x30] sm:$0xff] %v2783_v4 }
 0x2d3   :  { %2440 = vst [vmem:[#allocation8 + $0x28] sm:$0xff] %v2776_v2  ;;  %2442 = vst [vmem:[#allocation8 + $0x38] sm:$0xff] %v2784_v6 }
 0x2d5   :  { %v2320_v7 = vpop.f32.mrb[12].mxu0  ;;  %v2426_v45 = vpop.f32.mrb[12].mxu1 }
 0x2d6   :  { %v2777_v46 = vadd.f32 %v2320_v7, %v1566_v31  ;;  %v2785_v48 = vadd.f32 %v2426_v45, %v1574_v32  ;;  %v2322_v49 = vpop.f32.mrb[13].mxu0  ;;  %v2428_v50 = vpop.f32.mrb[13].mxu1 }
 0x2d7   :  { %v2778_v51 = vadd.f32 %v2322_v49, %v1570_v47  ;;  %v2786_v52 = vadd.f32 %v2428_v50, %v1578_v33  ;;  %v2324_v53 = vpop.f32.mrb[14].mxu0  ;;  %v2430_v54 = vpop.f32.mrb[14].mxu1 }
 0x2d8   :  { %2443 = vst [vmem:[#allocation8 + $0x40] sm:$0xff] %v2777_v46  ;;  %2445 = vst [vmem:[#allocation8 + $0x50] sm:$0xff] %v2785_v48  ;;  %v2779_v55 = vadd.f32 %v2324_v53, %v1566_v31  ;;  %v2787_v56 = vadd.f32 %v2430_v54, %v1574_v32  ;;  %v2326_v57 = vpop.f32.mrb[15].mxu0  ;;  %v2432_v58 = vpop.f32.mrb[15].mxu1 }
 0x2d9   :  { %2444 = vst [vmem:[#allocation8 + $0x48] sm:$0xff] %v2778_v51  ;;  %2446 = vst [vmem:[#allocation8 + $0x58] sm:$0xff] %v2786_v52  ;;  %v2780_v59 = vadd.f32 %v2326_v57, %v1570_v47  ;;  %v2788_v60 = vadd.f32 %v2432_v58, %v1578_v33 }
 0x2da   :  { %2447 = vst [vmem:[#allocation8 + $0x60] sm:$0xff] %v2779_v55  ;;  %2449 = vst [vmem:[#allocation8 + $0x70] sm:$0xff] %v2787_v56 }
 0x2db   :  { %2448 = vst [vmem:[#allocation8 + $0x68] sm:$0xff] %v2780_v59  ;;  %2450 = vst [vmem:[#allocation8 + $0x78] sm:$0xff] %v2788_v60 }
 0x2dc   :  { %2455 = vsyncadd [#allocation4], 512  ;;  %s3382_s4 = smov [#allocation8]  }
 0x2dd   :  { %s2456_s9 = sshll.u32 %s3382_s4, 4  ;;  %s2457_s9 = int_to_ptr.vmem [resolvable:$true] %s2456_s9 }
 0x2de   :  { %s3346_s10 = scalar_lea.vmem %s2457_s9, 1536  ;;  %s3350_s11 = scalar_lea.vmem %s2457_s9, 2048 }
 0x2df   :  { %p3347_p10 = scmp.ne.s32.totalorder %s2457_s9, %s3346_s10  ;;  %p3351_p11 = scmp.lt.s32.totalorder %s2457_s9, %s2457_s9 }
 0x2e0   :  { %p3352_p12 = scmp.lt.s32.totalorder %s3350_s11, %s3346_s10 }
 0x2e2   :  { %p3353_p13 = por %p3352_p12, %p3351_p11 }
 0x2e4   :  { %p3354_p0 = pnand %p3353_p13, %p3347_p10 }
 0x2e6   :  { %3357 = shalt.err (!%p3354_p0)
}
 0x2e7   :  { %s3358_s14 = scalar_lea.hbm %s3514_s5, 1536 }
 0x2e8   :  { %p3359_p1 = scmp.ne.s32.totalorder %s3514_s5, %s3358_s14  ;;  %p3362_p2 = scmp.lt.u32.totalorder %s3358_s14, %s3514_s5 }
 0x2ea   :  { %p3364_p3 = pnand %p3362_p2, %p3359_p1 }
 0x2ec   :  { %3367 = shalt.err (!%p3364_p3)
}
 0x2ed   :  { %s3383_s18 = smov 512   ;;  %s3384_s19 = smov 32  }
 0x2ee   :  { %2462 = dma.vmem_to_hbm [thread:$0]  %s2457_s9, 1536, %s3514_s5, [#allocation4], %s3383_s18, %s3383_s18, %s3384_s19  }
 0x2ef   :  { %3372 = dma.done.wait [#allocation4], 2048  }
 0x2f0   :  { %3373 = vsyncadd [#allocation4], 4294965248 }
 0x2f1   :  { %2466 = vsyncpa [#allocation3], 1 }
 0x2f2   :  { %2467 = vsyncpa [#allocation6], 1 }
 0x2f3   :  { %2468 = vsyncpa [#allocation4], 1 }

</bundles_post_ra>
